<compile_context>
chip_gen: v5e
topology: v5e:2x2
jax: 0.10.0
libtpu: 0.0.40
codegen_flags: <defaults>
</compile_context>

<pallas_src>
import functools

import jax
import jax.numpy as jnp
from jax.experimental import pallas as pl
from jax.experimental.pallas import tpu as pltpu


def _pointgencon_kernel(x_ref, w1_ref, b1_ref, w2_ref, b2_ref, w3_ref, b3_ref,
                        wt_ref, bt_ref, o_ref):
    x = x_ref[...]                                                   # (C, tn) bf16

    # conv1 + bn1 (folded) + relu
    h = jnp.dot(w1_ref[...], x, preferred_element_type=jnp.float32) + b1_ref[...]
    h = jnp.maximum(h, 0.0).astype(jnp.bfloat16)
    # conv2 + bn2 (folded) + relu
    h = jnp.dot(w2_ref[...], h, preferred_element_type=jnp.float32) + b2_ref[...]
    h = jnp.maximum(h, 0.0).astype(jnp.bfloat16)
    # conv3 + bn3 (folded) + relu
    h = jnp.dot(w3_ref[...], h, preferred_element_type=jnp.float32) + b3_ref[...]
    h = jnp.maximum(h, 0.0).astype(jnp.bfloat16)
    # conv4 + block-diagonal head convs, folded into one (10, c3) matmul
    z = jnp.dot(wt_ref[...], h, preferred_element_type=jnp.float32) + bt_ref[...]  # (10, tn)

    # Channels 0..6 -> tanh ; channels 7..9 -> 0.6 * sigmoid + 0.8
    # (EUP handles tanh/sigmoid; the where/select is a cheap VPU op on a tiny tile.)
    row = jax.lax.broadcasted_iota(jnp.int32, z.shape, dimension=0)
    out = jnp.where(row < 7, jnp.tanh(z), 0.6 * jax.nn.sigmoid(z) + 0.8)
    o_ref[...] = out.astype(o_ref.dtype)


@functools.partial(jax.jit, static_argnames=("tn",))
def pointgencon_forward(x_bcn, params, tn=256):
    """x_bcn: (B, C_bottleneck, N) float32 -> (B, 10, N) float32."""
    B, C, N = x_bcn.shape
    assert N % tn == 0, "N must be divisible by the lane tile tn"

    w1, b1, w2, b2, w3, b3, wt, bt = params
    c2, c3 = w2.shape[0], w3.shape[0]

    xb = x_bcn.astype(jnp.bfloat16)
    bf = lambda w: w.astype(jnp.bfloat16)
    full = lambda shape: pl.BlockSpec(shape, lambda b, j: (0, 0))

    out = pl.pallas_call(
        _pointgencon_kernel,
        out_shape=jax.ShapeDtypeStruct((B, 10, N), jnp.float32),
        grid_spec=pltpu.PrefetchScalarGridSpec(
            num_scalar_prefetch=0,
            grid=(B, N // tn),
            in_specs=[
                pl.BlockSpec((None, C, tn), lambda b, j: (b, 0, j)),  # x slab
                full((C, C)),   full((C, 1)),                         # conv1 (+bn1)
                full((c2, C)),  full((c2, 1)),                        # conv2 (+bn2)
                full((c3, c2)), full((c3, 1)),                        # conv3 (+bn3)
                full((10, c3)), full((10, 1)),                        # conv4 + head (folded)
            ],
            out_specs=pl.BlockSpec((None, 10, tn), lambda b, j: (b, 0, j)),
        ),
        compiler_params=pltpu.CompilerParams(
            dimension_semantics=("parallel", "parallel"),
            vmem_limit_bytes=48 * 1024 * 1024,
        ),
    )(xb, bf(w1), b1, bf(w2), b2, bf(w3), b3, bf(wt), bt)

    return out


def init_params(key, bottleneck_size):
    """Deterministic parameter init mimicking PyTorch Conv1d default ranges.

    Returns float32 params in  out = W @ x + b  convention:
      (w1, b1, w2, b2, w3, b3, w_tail, b_tail)
    with W shaped (C_out, C_in) and b shaped (C_out, 1).  BN (inference mode,
    mean=0/var=1) is folded into conv1..3; conv4 and the block-diagonal head
    convs are folded into (w_tail, b_tail).
    """
    c1, c2, c3 = bottleneck_size, bottleneck_size // 2, bottleneck_size // 4
    eps = 1e-5

    def conv_wb(key, cin, cout):
        kw, kb = jax.random.split(key)
        lim = 1.0 / jnp.sqrt(cin)
        w = jax.random.uniform(kw, (cout, cin), jnp.float32, -lim, lim)
        b = jax.random.uniform(kb, (cout,), jnp.float32, -lim, lim)
        return w, b

    keys = jax.random.split(key, 10)
    w1, b1 = conv_wb(keys[0], c1, c1)
    w2, b2 = conv_wb(keys[1], c1, c2)
    w3, b3 = conv_wb(keys[2], c2, c3)
    w4, b4 = conv_wb(keys[3], c3, 10)
    wc1, bc1 = conv_wb(keys[4], 4, 4)
    wc2, bc2 = conv_wb(keys[5], 3, 3)
    wc3, bc3 = conv_wb(keys[6], 3, 3)

    def bn_params(key, c):
        kg, kb = jax.random.split(key)
        gamma = 1.0 + 0.1 * jax.random.normal(kg, (c,), jnp.float32)
        beta = 0.1 * jax.random.normal(kb, (c,), jnp.float32)
        return gamma, beta

    g1, be1 = bn_params(keys[7], c1)
    g2, be2 = bn_params(keys[8], c2)
    g3, be3 = bn_params(keys[9], c3)

    # Fold inference-mode BN (mean=0, var=1) into conv: y = s*(Wx+b) + beta
    def fold_bn(w, b, gamma, beta):
        s = gamma / jnp.sqrt(1.0 + eps)
        return w * s[:, None], b * s + beta

    w1f, b1f = fold_bn(w1, b1, g1, be1)
    w2f, b2f = fold_bn(w2, b2, g2, be2)
    w3f, b3f = fold_bn(w3, b3, g3, be3)

    # Block-diagonal head (channel groups [0:4], [4:7], [7:10]) ...
    wh = jnp.zeros((10, 10), jnp.float32)
    wh = wh.at[0:4, 0:4].set(wc1)
    wh = wh.at[4:7, 4:7].set(wc2)
    wh = wh.at[7:10, 7:10].set(wc3)
    bh = jnp.concatenate([bc1, bc2, bc3])
    # ... folded with conv4:  z = (Wh @ W4) h + (Wh @ b4 + bh)
    wt = wh @ w4
    bt = wh @ b4 + bh

    col = lambda b: b.reshape(-1, 1)
    return (w1f, col(b1f), w2f, col(b2f), w3f, col(b3f), wt, col(bt))


def reference_forward(x_bcn, params):
    """Pure-JAX f32 reference with identical math, NCW layout throughout."""
    w1, b1, w2, b2, w3, b3, wt, bt = params
    h = jnp.maximum(jnp.einsum('oc,bcn->bon', w1, x_bcn) + b1[None], 0.0)
    h = jnp.maximum(jnp.einsum('oc,bcn->bon', w2, h) + b2[None], 0.0)
    h = jnp.maximum(jnp.einsum('oc,bcn->bon', w3, h) + b3[None], 0.0)
    z = jnp.einsum('oc,bcn->bon', wt, h) + bt[None]
    return jnp.concatenate(
        [jnp.tanh(z[:, :7, :]), 0.6 * jax.nn.sigmoid(z[:, 7:, :]) + 0.8], axis=1)


if __name__ == "__main__":
    bottleneck_size = 256   # small, divisible-by-4 stand-in for the default 2500
    B, N = 2, 512           # grid = (2, 2) with tn=256 -> megacore has work to shard

    key = jax.random.PRNGKey(0)
    kx, kp = jax.random.split(key)
    x = jax.random.normal(kx, (B, bottleneck_size, N), jnp.float32)  # NCW, like PyTorch
    params = init_params(kp, bottleneck_size)

    out = pointgencon_forward(x, params)
    out = jax.block_until_ready(out)
    assert out.shape == (B, 10, N), out.shape

    ref = reference_forward(x, params)   # f32 reference; kernel uses bf16 MXU inputs
    max_err = float(jnp.max(jnp.abs(out - ref)))
    assert max_err < 3e-2, f"mismatch vs reference: max abs err {max_err}"

    print("KERNEL_OK")
</pallas_src>

<mosaic_0001>
module attributes {stable_mosaic.version = 11 : i64} {
  func.func @_pointgencon_kernel(%arg0: i32, %arg1: i32, %arg2: memref<1x256x256xbf16, #tpu.memory_space<vmem>>, %arg3: memref<256x256xbf16, #tpu.memory_space<vmem>>, %arg4: memref<256x1xf32, #tpu.memory_space<vmem>>, %arg5: memref<128x256xbf16, #tpu.memory_space<vmem>>, %arg6: memref<128x1xf32, #tpu.memory_space<vmem>>, %arg7: memref<64x128xbf16, #tpu.memory_space<vmem>>, %arg8: memref<64x1xf32, #tpu.memory_space<vmem>>, %arg9: memref<10x64xbf16, #tpu.memory_space<vmem>>, %arg10: memref<10x1xf32, #tpu.memory_space<vmem>>, %arg11: memref<1x10x256xf32, #tpu.memory_space<vmem>>) attributes {dimension_semantics = [#tpu.dimension_semantics<parallel>, #tpu.dimension_semantics<parallel>], iteration_bounds = array<i64: 2, 2>, scalar_prefetch = 0 : i64, scratch_operands = 0 : i64, tpu.core_type = #tpu.core_type<tc>, window_params = [{transform_indices = @transform_0, window_bounds = array<i64: 1, 256, 256>}, {pipeline_mode = #tpu.pipeline_mode<synchronous>, transform_indices = @transform_1, window_bounds = array<i64: 256, 256>}, {pipeline_mode = #tpu.pipeline_mode<synchronous>, transform_indices = @transform_2, window_bounds = array<i64: 256, 1>}, {pipeline_mode = #tpu.pipeline_mode<synchronous>, transform_indices = @transform_3, window_bounds = array<i64: 128, 256>}, {pipeline_mode = #tpu.pipeline_mode<synchronous>, transform_indices = @transform_4, window_bounds = array<i64: 128, 1>}, {pipeline_mode = #tpu.pipeline_mode<synchronous>, transform_indices = @transform_5, window_bounds = array<i64: 64, 128>}, {pipeline_mode = #tpu.pipeline_mode<synchronous>, transform_indices = @transform_6, window_bounds = array<i64: 64, 1>}, {pipeline_mode = #tpu.pipeline_mode<synchronous>, transform_indices = @transform_7, window_bounds = array<i64: 10, 64>}, {pipeline_mode = #tpu.pipeline_mode<synchronous>, transform_indices = @transform_8, window_bounds = array<i64: 10, 1>}, {transform_indices = @transform_9, window_bounds = array<i64: 1, 10, 256>}]} {
    %c0 = arith.constant 0 : index
    %c0_0 = arith.constant 0 : index
    %c0_1 = arith.constant 0 : index
    %0 = vector.load %arg2[%c0, %c0_0, %c0_1] : memref<1x256x256xbf16, #tpu.memory_space<vmem>>, vector<1x256x256xbf16>
    %1 = vector.shape_cast %0 : vector<1x256x256xbf16> to vector<256x256xbf16>
    %c0_2 = arith.constant 0 : index
    %c0_3 = arith.constant 0 : index
    %2 = vector.load %arg3[%c0_2, %c0_3] : memref<256x256xbf16, #tpu.memory_space<vmem>>, vector<256x256xbf16>
    %cst = arith.constant dense<0.000000e+00> : vector<256x256xf32>
    %3 = tpu.matmul %2, %1, %cst {dimension_numbers = #tpu.dot_dimension_numbers<[1], [0], [0], [1], [0, 0, 1, 1], [], []>} : vector<256x256xbf16>, vector<256x256xbf16>, vector<256x256xf32> -> vector<256x256xf32>
    %c0_4 = arith.constant 0 : index
    %c0_5 = arith.constant 0 : index
    %4 = vector.load %arg4[%c0_4, %c0_5] : memref<256x1xf32, #tpu.memory_space<vmem>>, vector<256x1xf32>
    %5 = vector.broadcast %4 : vector<256x1xf32> to vector<256x256xf32>
    %6 = arith.addf %3, %5 : vector<256x256xf32>
    %cst_6 = arith.constant 0.000000e+00 : f32
    %7 = vector.broadcast %cst_6 : f32 to vector<256x256xf32>
    %8 = arith.maximumf %6, %7 : vector<256x256xf32>
    %9 = arith.truncf %8 : vector<256x256xf32> to vector<256x256xbf16>
    %c0_7 = arith.constant 0 : index
    %c0_8 = arith.constant 0 : index
    %10 = vector.load %arg5[%c0_7, %c0_8] : memref<128x256xbf16, #tpu.memory_space<vmem>>, vector<128x256xbf16>
    %cst_9 = arith.constant dense<0.000000e+00> : vector<128x256xf32>
    %11 = tpu.matmul %10, %9, %cst_9 {dimension_numbers = #tpu.dot_dimension_numbers<[1], [0], [0], [1], [0, 0, 1, 1], [], []>} : vector<128x256xbf16>, vector<256x256xbf16>, vector<128x256xf32> -> vector<128x256xf32>
    %c0_10 = arith.constant 0 : index
    %c0_11 = arith.constant 0 : index
    %12 = vector.load %arg6[%c0_10, %c0_11] : memref<128x1xf32, #tpu.memory_space<vmem>>, vector<128x1xf32>
    %13 = vector.broadcast %12 : vector<128x1xf32> to vector<128x256xf32>
    %14 = arith.addf %11, %13 : vector<128x256xf32>
    %cst_12 = arith.constant 0.000000e+00 : f32
    %15 = vector.broadcast %cst_12 : f32 to vector<128x256xf32>
    %16 = arith.maximumf %14, %15 : vector<128x256xf32>
    %17 = arith.truncf %16 : vector<128x256xf32> to vector<128x256xbf16>
    %c0_13 = arith.constant 0 : index
    %c0_14 = arith.constant 0 : index
    %18 = vector.load %arg7[%c0_13, %c0_14] : memref<64x128xbf16, #tpu.memory_space<vmem>>, vector<64x128xbf16>
    %cst_15 = arith.constant dense<0.000000e+00> : vector<64x256xf32>
    %19 = tpu.matmul %18, %17, %cst_15 {dimension_numbers = #tpu.dot_dimension_numbers<[1], [0], [0], [1], [0, 0, 1, 1], [], []>} : vector<64x128xbf16>, vector<128x256xbf16>, vector<64x256xf32> -> vector<64x256xf32>
    %c0_16 = arith.constant 0 : index
    %c0_17 = arith.constant 0 : index
    %20 = vector.load %arg8[%c0_16, %c0_17] : memref<64x1xf32, #tpu.memory_space<vmem>>, vector<64x1xf32>
    %21 = vector.broadcast %20 : vector<64x1xf32> to vector<64x256xf32>
    %22 = arith.addf %19, %21 : vector<64x256xf32>
    %cst_18 = arith.constant 0.000000e+00 : f32
    %23 = vector.broadcast %cst_18 : f32 to vector<64x256xf32>
    %24 = arith.maximumf %22, %23 : vector<64x256xf32>
    %25 = arith.truncf %24 : vector<64x256xf32> to vector<64x256xbf16>
    %c0_19 = arith.constant 0 : index
    %c0_20 = arith.constant 0 : index
    %26 = vector.load %arg9[%c0_19, %c0_20] : memref<10x64xbf16, #tpu.memory_space<vmem>>, vector<10x64xbf16>
    %cst_21 = arith.constant dense<0.000000e+00> : vector<10x256xf32>
    %27 = tpu.matmul %26, %25, %cst_21 {dimension_numbers = #tpu.dot_dimension_numbers<[1], [0], [0], [1], [0, 0, 1, 1], [], []>} : vector<10x64xbf16>, vector<64x256xbf16>, vector<10x256xf32> -> vector<10x256xf32>
    %c0_22 = arith.constant 0 : index
    %c0_23 = arith.constant 0 : index
    %28 = vector.load %arg10[%c0_22, %c0_23] : memref<10x1xf32, #tpu.memory_space<vmem>>, vector<10x1xf32>
    %29 = vector.broadcast %28 : vector<10x1xf32> to vector<10x256xf32>
    %30 = arith.addf %27, %29 : vector<10x256xf32>
    %31 = tpu.iota {dimensions = array<i32: 0>} : vector<10x256xi32>
    %c7_i32 = arith.constant 7 : i32
    %32 = vector.broadcast %c7_i32 : i32 to vector<10x256xi32>
    %33 = arith.cmpi slt, %31, %32 : vector<10x256xi32>
    %34 = math.tanh %30 : vector<10x256xf32>
    %35 = arith.negf %30 : vector<10x256xf32>
    %36 = math.exp %35 : vector<10x256xf32>
    %cst_24 = arith.constant 1.000000e+00 : f32
    %37 = vector.broadcast %cst_24 : f32 to vector<10x256xf32>
    %38 = arith.addf %37, %36 : vector<10x256xf32>
    %39 = arith.divf %37, %38 : vector<10x256xf32>
    %cst_25 = arith.constant 6.000000e-01 : f32
    %40 = vector.broadcast %cst_25 : f32 to vector<10x256xf32>
    %41 = arith.mulf %40, %39 : vector<10x256xf32>
    %cst_26 = arith.constant 8.000000e-01 : f32
    %42 = vector.broadcast %cst_26 : f32 to vector<10x256xf32>
    %43 = arith.addf %41, %42 : vector<10x256xf32>
    %44 = arith.select %33, %34, %43 : vector<10x256xi1>, vector<10x256xf32>
    %c0_27 = arith.constant 0 : index
    %c0_28 = arith.constant 0 : index
    %c0_29 = arith.constant 0 : index
    %45 = vector.load %arg11[%c0_27, %c0_28, %c0_29] : memref<1x10x256xf32, #tpu.memory_space<vmem>>, vector<1x10x256xf32>
    %46 = vector.shape_cast %45 : vector<1x10x256xf32> to vector<10x256xf32>
    %47 = vector.shape_cast %44 : vector<10x256xf32> to vector<1x10x256xf32>
    tpu.vector_store %arg11[%c0_27, %c0_28, %c0_29], %47 {strides = array<i32>} : memref<1x10x256xf32, #tpu.memory_space<vmem>>, vector<1x10x256xf32>,
    return
  }
  func.func @transform_0(%arg0: i32, %arg1: i32) -> (i32, i32, i32) {
    %c0_i32 = arith.constant 0 : i32
    %c0_i32_0 = arith.constant 0 : i32
    return %arg0, %c0_i32, %arg1 : i32, i32, i32
  }
  func.func @transform_1(%arg0: i32, %arg1: i32) -> (i32, i32) {
    %c0_i32 = arith.constant 0 : i32
    %c0_i32_0 = arith.constant 0 : i32
    %c0_i32_1 = arith.constant 0 : i32
    return %c0_i32, %c0_i32_0 : i32, i32
  }
  func.func @transform_2(%arg0: i32, %arg1: i32) -> (i32, i32) {
    %c0_i32 = arith.constant 0 : i32
    %c0_i32_0 = arith.constant 0 : i32
    %c0_i32_1 = arith.constant 0 : i32
    return %c0_i32, %c0_i32_0 : i32, i32
  }
  func.func @transform_3(%arg0: i32, %arg1: i32) -> (i32, i32) {
    %c0_i32 = arith.constant 0 : i32
    %c0_i32_0 = arith.constant 0 : i32
    %c0_i32_1 = arith.constant 0 : i32
    return %c0_i32, %c0_i32_0 : i32, i32
  }
  func.func @transform_4(%arg0: i32, %arg1: i32) -> (i32, i32) {
    %c0_i32 = arith.constant 0 : i32
    %c0_i32_0 = arith.constant 0 : i32
    %c0_i32_1 = arith.constant 0 : i32
    return %c0_i32, %c0_i32_0 : i32, i32
  }
  func.func @transform_5(%arg0: i32, %arg1: i32) -> (i32, i32) {
    %c0_i32 = arith.constant 0 : i32
    %c0_i32_0 = arith.constant 0 : i32
    %c0_i32_1 = arith.constant 0 : i32
    return %c0_i32, %c0_i32_0 : i32, i32
  }
  func.func @transform_6(%arg0: i32, %arg1: i32) -> (i32, i32) {
    %c0_i32 = arith.constant 0 : i32
    %c0_i32_0 = arith.constant 0 : i32
    %c0_i32_1 = arith.constant 0 : i32
    return %c0_i32, %c0_i32_0 : i32, i32
  }
  func.func @transform_7(%arg0: i32, %arg1: i32) -> (i32, i32) {
    %c0_i32 = arith.constant 0 : i32
    %c0_i32_0 = arith.constant 0 : i32
    %c0_i32_1 = arith.constant 0 : i32
    return %c0_i32, %c0_i32_0 : i32, i32
  }
  func.func @transform_8(%arg0: i32, %arg1: i32) -> (i32, i32) {
    %c0_i32 = arith.constant 0 : i32
    %c0_i32_0 = arith.constant 0 : i32
    %c0_i32_1 = arith.constant 0 : i32
    return %c0_i32, %c0_i32_0 : i32, i32
  }
  func.func @transform_9(%arg0: i32, %arg1: i32) -> (i32, i32, i32) {
    %c0_i32 = arith.constant 0 : i32
    %c0_i32_0 = arith.constant 0 : i32
    return %arg0, %c0_i32, %arg1 : i32, i32, i32
  }
}

</mosaic_0001>

<bundles_post_ra>
// kernel: pointgencon_forward.1
= control target key start
LH: loop header
LB: loop body
LE: loop exit
PB: predicated region body
PF: predicated region fallthrough
CT: control target
= control target key end

     0   :  { %s3046_s30 = smov 0   ;;  %s3048_s10 = smov 0   ;;  %s4141_s0 = inlined_call_operand.vmem [shape: bf16[2,256,512], index: 0, kind: input, shape index: {}]   ;;  %s4142_s1 = inlined_call_operand.vmem [shape: bf16[256,256], index: 1, kind: input, shape index: {}]   ;;  %s4143_s2 = inlined_call_operand.vmem [shape: f32[256,1], index: 2, kind: input, shape index: {}]   ;;  %s4144_s3 = inlined_call_operand.vmem [shape: bf16[128,256], index: 3, kind: input, shape index: {}]   ;;  %s4145_s4 = inlined_call_operand.vmem [shape: f32[128,1], index: 4, kind: input, shape index: {}]   ;;  %s4146_s5 = inlined_call_operand.vmem [shape: bf16[64,128], index: 5, kind: input, shape index: {}]   ;;  %s4147_s6 = inlined_call_operand.vmem [shape: f32[64,1], index: 6, kind: input, shape index: {}]   ;;  %s4148_s7 = inlined_call_operand.vmem [shape: bf16[10,64], index: 7, kind: input, shape index: {}]   ;;  %s4149_s8 = inlined_call_operand.vmem [shape: f32[10,1], index: 8, kind: input, shape index: {}]   ;;  %s4150_s9 = inlined_call_operand.vmem [shape: f32[2,10,512], index: 9, kind: output, shape index: {}]  }
   0x1   :  { %s3050_s11 = smov 0   ;;  %s3052_s12 = smov 0  }
   0x2   :  { %s3054_s13 = smov 0   ;;  %s3056_s14 = smov 0  }
   0x3   :  { %s3058_s15 = smov 0  }
   0x4 LB: > { %s28_s16 = sadd.s32 1, %s2985_s13  ;;  %s31_s17 = sadd.s32 1, %s2989_s14  ;;  %s2993_s15 = sphi %s3058_s15, %s19_s15   ;;  %s2989_s14 = sphi %s3056_s14, %s4206_s14   ;;  %s2985_s13 = sphi %s3054_s13, %s4205_s13   ;;  %s2981_s12 = sphi %s3052_s12, %s4204_s12   ;;  %s2977_s11 = sphi %s3050_s11, %s4203_s11   ;;  %s2973_s10 = sphi %s3048_s10, %s4202_s10   ;;  %s2969_s30 = sphi %s3046_s30, %s4201_s30  }
   0x5   : > { %p29_p0 = scmp.ge.s32.totalorder %s28_s16, 2  ;;  %s2395_s18 = sadd.s32 4294967295, %s2993_s15  }
   0x6   : > { %p47_p1 = scmp.ne.s32.totalorder %s2973_s10, %s2969_s30  ;;  %p48_p2 = scmp.eq.s32.totalorder %s2993_s15, 0 }
   0x7   : > { %s4208_s16 = smov (%p29_p0, %s28_s16), 0  ;;  %s4210_s17 = smov (!%p29_p0, %s31_s17), %s2989_s14 }
   0x8   : > { %4160 = sst [smem:[#allocation4_spill]] %s4208_s16  ;;  %p33_p3 = scmp.ge.s32.totalorder %s4210_s17, 2 }
   0x9   : > { %p247_p4 = scmp.eq.s32.totalorder %s2395_s18, 3  ;;  %s36_s19 = ssub.s32 %s2985_s13, %s4208_s16 }
   0xa   : > { %p49_p5 = por %p48_p2, %p47_p1  ;;  %s4212_s17 = smov (%p33_p3, %s4210_s17), 0 }
   0xb   : > { %4161 = sst [smem:[#allocation5_spill]] %s4212_s17  ;;  %p3094_p6 = por %p247_p4, %p47_p1 }
   0xc   : > { %s35_s21 = ssub.s32 %s2989_s14, %s4212_s17  ;;  %s40_s23 = sadd.s32 1, %s2973_s10 }
   0xd   : > { %s37_s22 = sor.u32 %s36_s19, %s35_s21  ;;  %p2398_p8 = scmp.ge.s32.totalorder %s2993_s15, 4 }
   0xe   : > { %p38_p7 = scmp.eq.s32.totalorder %s37_s22, 0 }
   0xf   : > { %293 = sbr.rel (%p2398_p8) target bundleno = 59 (0x3b), region = 48 }
  0x10   : > { %s3102_s24 = scalar_select %p38_p7, %s2973_s10, %s40_s23  }
  0x14   : > { %296 = sbr.rel (!%p49_p5) target bundleno = 59 (0x3b), region = 52  ;;  %s298_s25 = sand.u32 (%p49_p5), 1, %s2973_s10  }
  0x15   : > { %s2400_s26 = sshll.u32 (%p49_p5), %s2985_s13, 1  ;;  %s2399_s27 = sshll.u32 (%p49_p5), %s298_s25, 8 }
  0x16   : > { %s2401_s28 = sshll.u32 (%p49_p5), %s2989_s14, 7  ;;  %s3116_s21 = scalar_lea.vmem (%p49_p5), [#allocation2], %s2399_s27 }
  0x17   : > { %s303_s29 = sadd.s32 (%p49_p5), %s2401_s28, %s2400_s26 }
  0x18   : > { %s2402_s18 = sshll.u32 (%p49_p5), %s303_s29, 2 }
  0x19   : > { %s3111_s19 = scalar_lea.vmem %s4141_s0, %s2402_s18 }
  0x1a   : > { %v396_v0 = vld [vmem:[%s3111_s19] sm:$0xff]  ;;  %v398_v1 = vld [vmem:[%s3111_s19 + $0x10] sm:$0xff] }
  0x1b   : > { %v400_v2 = vld [vmem:[%s3111_s19 + $0x20] sm:$0xff]  ;;  %397 = vst [vmem:[%s3116_s21] sm:$0xff] %v396_v0  ;;  %v402_v3 = vld [vmem:[%s3111_s19 + $0x30] sm:$0xff] }
  0x1c   : > { %399 = vst [vmem:[%s3116_s21 + $0x8] sm:$0xff] %v398_v1  ;;  %v404_v4 = vld [vmem:[%s3111_s19 + $0x40] sm:$0xff]  ;;  %v406_v5 = vld [vmem:[%s3111_s19 + $0x50] sm:$0xff] }
  0x1d   : > { %401 = vst [vmem:[%s3116_s21 + $0x10] sm:$0xff] %v400_v2  ;;  %v408_v6 = vld [vmem:[%s3111_s19 + $0x60] sm:$0xff]  ;;  %v410_v7 = vld [vmem:[%s3111_s19 + $0x70] sm:$0xff] }
  0x1e   : > { %403 = vst [vmem:[%s3116_s21 + $0x18] sm:$0xff] %v402_v3  ;;  %v412_v8 = vld [vmem:[%s3111_s19 + $0x80] sm:$0xff]  ;;  %v414_v9 = vld [vmem:[%s3111_s19 + $0x90] sm:$0xff] }
  0x1f   : > { %405 = vst [vmem:[%s3116_s21 + $0x20] sm:$0xff] %v404_v4  ;;  %v416_v10 = vld [vmem:[%s3111_s19 + $0xa0] sm:$0xff]  ;;  %v418_v11 = vld [vmem:[%s3111_s19 + $0xb0] sm:$0xff] }
  0x20   : > { %407 = vst [vmem:[%s3116_s21 + $0x28] sm:$0xff] %v406_v5  ;;  %v420_v12 = vld [vmem:[%s3111_s19 + $0xc0] sm:$0xff]  ;;  %v422_v13 = vld [vmem:[%s3111_s19 + $0xd0] sm:$0xff] }
  0x21   : > { %409 = vst [vmem:[%s3116_s21 + $0x30] sm:$0xff] %v408_v6  ;;  %v424_v14 = vld [vmem:[%s3111_s19 + $0xe0] sm:$0xff]  ;;  %v426_v15 = vld [vmem:[%s3111_s19 + $0xf0] sm:$0xff] }
  0x22   : > { %411 = vst [vmem:[%s3116_s21 + $0x38] sm:$0xff] %v410_v7  ;;  %v428_v16 = vld [vmem:[%s3111_s19 + $0x100] sm:$0xff]  ;;  %v430_v17 = vld [vmem:[%s3111_s19 + $0x110] sm:$0xff] }
  0x23   : > { %413 = vst [vmem:[%s3116_s21 + $0x40] sm:$0xff] %v412_v8  ;;  %v432_v18 = vld [vmem:[%s3111_s19 + $0x120] sm:$0xff]  ;;  %v434_v19 = vld [vmem:[%s3111_s19 + $0x130] sm:$0xff] }
  0x24   : > { %415 = vst [vmem:[%s3116_s21 + $0x48] sm:$0xff] %v414_v9  ;;  %v436_v20 = vld [vmem:[%s3111_s19 + $0x140] sm:$0xff]  ;;  %v438_v21 = vld [vmem:[%s3111_s19 + $0x150] sm:$0xff] }
  0x25   : > { %417 = vst [vmem:[%s3116_s21 + $0x50] sm:$0xff] %v416_v10  ;;  %v440_v22 = vld [vmem:[%s3111_s19 + $0x160] sm:$0xff]  ;;  %v442_v23 = vld [vmem:[%s3111_s19 + $0x170] sm:$0xff] }
  0x26   : > { %419 = vst [vmem:[%s3116_s21 + $0x58] sm:$0xff] %v418_v11  ;;  %v444_v24 = vld [vmem:[%s3111_s19 + $0x180] sm:$0xff]  ;;  %v446_v25 = vld [vmem:[%s3111_s19 + $0x190] sm:$0xff] }
  0x27   : > { %421 = vst [vmem:[%s3116_s21 + $0x60] sm:$0xff] %v420_v12  ;;  %v448_v26 = vld [vmem:[%s3111_s19 + $0x1a0] sm:$0xff]  ;;  %v450_v27 = vld [vmem:[%s3111_s19 + $0x1b0] sm:$0xff] }
  0x28   : > { %423 = vst [vmem:[%s3116_s21 + $0x68] sm:$0xff] %v422_v13  ;;  %v452_v28 = vld [vmem:[%s3111_s19 + $0x1c0] sm:$0xff]  ;;  %v454_v29 = vld [vmem:[%s3111_s19 + $0x1d0] sm:$0xff] }
  0x29   : > { %425 = vst [vmem:[%s3116_s21 + $0x70] sm:$0xff] %v424_v14  ;;  %v456_v30 = vld [vmem:[%s3111_s19 + $0x1e0] sm:$0xff]  ;;  %v458_v31 = vld [vmem:[%s3111_s19 + $0x1f0] sm:$0xff] }
  0x2a   : > { %427 = vst [vmem:[%s3116_s21 + $0x78] sm:$0xff] %v426_v15 }
  0x2b   : > { %429 = vst [vmem:[%s3116_s21 + $0x80] sm:$0xff] %v428_v16 }
  0x2c   : > { %431 = vst [vmem:[%s3116_s21 + $0x88] sm:$0xff] %v430_v17 }
  0x2d   : > { %433 = vst [vmem:[%s3116_s21 + $0x90] sm:$0xff] %v432_v18 }
  0x2e   : > { %435 = vst [vmem:[%s3116_s21 + $0x98] sm:$0xff] %v434_v19 }
  0x2f   : > { %437 = vst [vmem:[%s3116_s21 + $0xa0] sm:$0xff] %v436_v20 }
  0x30   : > { %439 = vst [vmem:[%s3116_s21 + $0xa8] sm:$0xff] %v438_v21 }
  0x31   : > { %441 = vst [vmem:[%s3116_s21 + $0xb0] sm:$0xff] %v440_v22 }
  0x32   : > { %443 = vst [vmem:[%s3116_s21 + $0xb8] sm:$0xff] %v442_v23 }
  0x33   : > { %445 = vst [vmem:[%s3116_s21 + $0xc0] sm:$0xff] %v444_v24 }
  0x34   : > { %447 = vst [vmem:[%s3116_s21 + $0xc8] sm:$0xff] %v446_v25 }
  0x35   : > { %449 = vst [vmem:[%s3116_s21 + $0xd0] sm:$0xff] %v448_v26 }
  0x36   : > { %451 = vst [vmem:[%s3116_s21 + $0xd8] sm:$0xff] %v450_v27 }
  0x37   : > { %453 = vst [vmem:[%s3116_s21 + $0xe0] sm:$0xff] %v452_v28 }
  0x38   : > { %455 = vst [vmem:[%s3116_s21 + $0xe8] sm:$0xff] %v454_v29 }
  0x39   : > { %457 = vst [vmem:[%s3116_s21 + $0xf0] sm:$0xff] %v456_v30 }
  0x3a   : > { %459 = vst [vmem:[%s3116_s21 + $0xf8] sm:$0xff] %v458_v31 }
  0x3b PF: > { %p2403_p9 = scmp.ge.s32.totalorder %s2993_s15, 1  ;;  %p464_p10 = scmp.lt.s32.totalorder %s2993_s15, 5 }
  0x3d   : > { %p465_p11 = pnand %p2403_p9, %p464_p10 }
  0x3f   : > { %468 = sbr.rel (%p465_p11) target bundleno = 1180 (0x49c), region = 90 }
  0x44   : > { %v602_v32 = vld [vmem:[%s4143_s2 + $0xf0] sm:$0xff]  ;;  %s471_s25 = sand.u32 1, %s2969_s30   ;;  %v2995_v34 = vmov 0   ;;  %v584_v35 = vld [vmem:[%s4143_s2 + $0x60] sm:$0xff]  ;;  %v603_v47 = vld [vmem:[%s4143_s2 + $0xf8] sm:$0xff]  ;;  %vm2153_vm0 = vcmask 523264  }
  0x45   : > { %v586_v33 = vld [vmem:[%s4143_s2 + $0x70] sm:$0xff]  ;;  %2917 = vset.pattern.permute.xlu1 %v2995_v34  ;;  %2916 = vset.pattern.permute.xlu0 %v2995_v34  ;;  %s2404_s26 = sshll.u32 %s471_s25, 8  ;;  %v587_v58 = vld [vmem:[%s4143_s2 + $0x78] sm:$0xff]  ;;  %v585_v63 = vld [vmem:[%s4143_s2 + $0x68] sm:$0xff]  ;;  %s2754_s27 = sshll.u32 (%p3094_p6), %s2981_s12, 3 }
  0x46   : > { %756 = vperm.xlu1 %2917, %v602_v32   ;;  %676 = vperm.xlu0 %2916, %v586_v33   ;;  %s3193_s29 = scalar_lea.vmem [#allocation2], %s2404_s26  ;;  %v601_v19 = vld [vmem:[%s4143_s2 + $0xe8] sm:$0xff]  ;;  %v600_v30 = vld [vmem:[%s4143_s2 + $0xe0] sm:$0xff]  ;;  %s2405_s26 = sshll.u32 %s471_s25, 5 }
  0x47   : > { %v2592_v36 = vld [vmem:[%s3193_s29 + $0x70] sm:$0xf]  ;;  %v2773_v37 = vld [vmem:[%s3193_s29 + $0x74] sm:$0xf0]  ;;  %v2772_v38 = vld [vmem:[%s3193_s29 + $0x74] sm:$0xf]  ;;  %2918 = vset.pattern.permute.xlu2 %v2995_v34 }
  0x48   : > { %v2593_v39 = vor.u32 %v2773_v37, %v2592_v36  ;;  %v2594_v40 = vld [vmem:[%s3193_s29 + $0x78] sm:$0xf0]  ;;  %v2788_v41 = vld [vmem:[%s3193_s29 + $0xf4] sm:$0xf]  ;;  %666 = vperm.xlu2 %2918, %v584_v35   ;;  %v2656_v45 = vld [vmem:[%s3193_s29 + $0xf0] sm:$0xf] }
  0x49   : > { %v2658_v42 = vld [vmem:[%s3193_s29 + $0xf8] sm:$0xf0]  ;;  %v2597_v43 = vor.u32 %v2772_v38, %v2594_v40  ;;  %v2789_v46 = vld [vmem:[%s3193_s29 + $0xf4] sm:$0xf0]  ;;  %v2584_v48 = vld [vmem:[%s3193_s29 + $0x60] sm:$0xf] }
  0x4a   : > { %v2661_v44 = vor.u32 %v2788_v41, %v2658_v42  ;;  %1084 = vmatpush.bf16.msra.mxu0 %v2593_v39  ;;  %v2657_v49 = vor.u32 %v2789_v46, %v2656_v45  ;;  %v2771_v50 = vld [vmem:[%s3193_s29 + $0x64] sm:$0xf0]  ;;  %v2770_v51 = vld [vmem:[%s3193_s29 + $0x64] sm:$0xf]  ;;  %v2586_v52 = vld [vmem:[%s3193_s29 + $0x68] sm:$0xf0] }
  0x4b   : > { %1262 = vmatpush.bf16.msra.mxu2 %v2597_v43  ;;  %v2585_v53 = vor.u32 %v2771_v50, %v2584_v48  ;;  %v2589_v54 = vor.u32 %v2770_v51, %v2586_v52  ;;  %v2786_v55 = vld [vmem:[%s3193_s29 + $0xe4] sm:$0xf]  ;;  %v2650_v56 = vld [vmem:[%s3193_s29 + $0xe8] sm:$0xf0]  ;;  %v2648_v57 = vld [vmem:[%s3193_s29 + $0xe0] sm:$0xf] }
  0x4c   : > { %1351 = vmatpush.bf16.msra.mxu3 %v2661_v44  ;;  %1173 = vmatpush.bf16.msra.mxu1 %v2657_v49  ;;  %v2653_v59 = vor.u32 %v2786_v55, %v2650_v56  ;;  %v2787_v60 = vld [vmem:[%s3193_s29 + $0xe4] sm:$0xf0]  ;;  %v2576_v61 = vld [vmem:[%s3193_s29 + $0x50] sm:$0xf]  ;;  %v2769_v62 = vld [vmem:[%s3193_s29 + $0x54] sm:$0xf0] }
  0x4d   : > { %v2649_v0 = vor.u32 %v2787_v60, %v2648_v57  ;;  %v2768_v1 = vld [vmem:[%s3193_s29 + $0x54] sm:$0xf]  ;;  %v2578_v2 = vld [vmem:[%s3193_s29 + $0x58] sm:$0xf0]  ;;  %v2577_v4 = vor.u32 %v2769_v62, %v2576_v61  ;;  %v2640_v6 = vld [vmem:[%s3193_s29 + $0xd0] sm:$0xf] }
  0x4e   : > { %v2784_v3 = vld [vmem:[%s3193_s29 + $0xd4] sm:$0xf]  ;;  %761 = vperm.xlu1 %2917, %v603_v47   ;;  %1085 = vmatpush.bf16.msra.mxu0 %v2585_v53  ;;  %v2642_v5 = vld [vmem:[%s3193_s29 + $0xd8] sm:$0xf0]  ;;  %v2785_v7 = vld [vmem:[%s3193_s29 + $0xd4] sm:$0xf0]  ;;  %v2581_v8 = vor.u32 %v2768_v1, %v2578_v2 }
  0x4f   : > { %1263 = vmatpush.bf16.msra.mxu2 %v2589_v54  ;;  %v2645_v9 = vor.u32 %v2784_v3, %v2642_v5  ;;  %v2568_v10 = vld [vmem:[%s3193_s29 + $0x40] sm:$0xf]  ;;  %v2767_v11 = vld [vmem:[%s3193_s29 + $0x44] sm:$0xf0]  ;;  %v2766_v12 = vld [vmem:[%s3193_s29 + $0x44] sm:$0xf]  ;;  %681 = vperm.xlu0 %2916, %v587_v58   ;;  %v2641_v13 = vor.u32 %v2785_v7, %v2640_v6 }
  0x50   : > { %1352 = vmatpush.bf16.msra.mxu3 %v2653_v59  ;;  %1174 = vmatpush.bf16.msra.mxu1 %v2649_v0  ;;  %v2570_v14 = vld [vmem:[%s3193_s29 + $0x48] sm:$0xf0]  ;;  %v2782_v15 = vld [vmem:[%s3193_s29 + $0xc4] sm:$0xf]  ;;  %v2632_v17 = vld [vmem:[%s3193_s29 + $0xc0] sm:$0xf]  ;;  %v2569_v20 = vor.u32 %v2767_v11, %v2568_v10 }
  0x51   : > { %v2634_v16 = vld [vmem:[%s3193_s29 + $0xc8] sm:$0xf0]  ;;  %671 = vperm.xlu2 %2918, %v585_v63   ;;  %v2783_v18 = vld [vmem:[%s3193_s29 + $0xc4] sm:$0xf0]  ;;  %v2573_v21 = vor.u32 %v2766_v12, %v2570_v14  ;;  %v2560_v23 = vld [vmem:[%s3193_s29 + $0x30] sm:$0xf] }
  0x52   : > { %1086 = vmatpush.bf16.msra.mxu0 %v2577_v4  ;;  %v2637_v22 = vor.u32 %v2782_v15, %v2634_v16  ;;  %v2765_v24 = vld [vmem:[%s3193_s29 + $0x34] sm:$0xf0]  ;;  %v2764_v25 = vld [vmem:[%s3193_s29 + $0x34] sm:$0xf]  ;;  %v2633_v26 = vor.u32 %v2783_v18, %v2632_v17  ;;  %v2562_v27 = vld [vmem:[%s3193_s29 + $0x38] sm:$0xf0] }
  0x53   : > { %1264 = vmatpush.bf16.msra.mxu2 %v2581_v8  ;;  %v2780_v28 = vld [vmem:[%s3193_s29 + $0xb4] sm:$0xf]  ;;  %v2626_v29 = vld [vmem:[%s3193_s29 + $0xb8] sm:$0xf0]  ;;  %v2624_v31 = vld [vmem:[%s3193_s29 + $0xb0] sm:$0xf]  ;;  %v2561_v33 = vor.u32 %v2765_v24, %v2560_v23  ;;  %v2565_v35 = vor.u32 %v2764_v25, %v2562_v27 }
  0x54   : > { %1353 = vmatpush.bf16.msra.mxu3 %v2645_v9  ;;  %1175 = vmatpush.bf16.msra.mxu1 %v2641_v13  ;;  %v2781_v32 = vld [vmem:[%s3193_s29 + $0xb4] sm:$0xf0]  ;;  %v582_v34 = vld [vmem:[%s4143_s2 + $0x50] sm:$0xff]  ;;  %v2629_v36 = vor.u32 %v2780_v28, %v2626_v29  ;;  %v2552_v37 = vld [vmem:[%s3193_s29 + $0x20] sm:$0xf]  ;;  %s4101_s30 = scalar_lea.vmem [#allocation3], %s2405_s26 }
  0x55   : > { %v2763_v38 = vld [vmem:[%s3193_s29 + $0x24] sm:$0xf0]  ;;  %v2762_v39 = vld [vmem:[%s3193_s29 + $0x24] sm:$0xf]  ;;  %v2625_v40 = vor.u32 %v2781_v32, %v2624_v31  ;;  %v2554_v41 = vld [vmem:[%s3193_s29 + $0x28] sm:$0xf0] }
  0x56   : > { %751 = vperm.xlu1 %2917, %v601_v19   ;;  %1087 = vmatpush.bf16.msra.mxu0 %v2569_v20  ;;  %v2778_v42 = vld [vmem:[%s3193_s29 + $0xa4] sm:$0xf]  ;;  %v2618_v43 = vld [vmem:[%s3193_s29 + $0xa8] sm:$0xf0]  ;;  %v2616_v44 = vld [vmem:[%s3193_s29 + $0xa0] sm:$0xf]  ;;  %v2553_v47 = vor.u32 %v2763_v38, %v2552_v37  ;;  %v2557_v48 = vor.u32 %v2762_v39, %v2554_v41 }
  0x57   : > { %1265 = vmatpush.bf16.msra.mxu2 %v2573_v21  ;;  %746 = vperm.xlu0 %2916, %v600_v30   ;;  %v2779_v45 = vld [vmem:[%s3193_s29 + $0xa4] sm:$0xf0]  ;;  %v598_v46 = vld [vmem:[%s4143_s2 + $0xd0] sm:$0xff]  ;;  %v2621_v49 = vor.u32 %v2778_v42, %v2618_v43  ;;  %v2761_v51 = vld [vmem:[%s3193_s29 + $0x14] sm:$0xf0]  ;;  %s2753_s25 = sshll.u32 (%p3094_p6), %s2977_s11, 1 }
  0x58   : > { %1354 = vmatpush.bf16.msra.mxu3 %v2637_v22  ;;  %1176 = vmatpush.bf16.msra.mxu1 %v2633_v26  ;;  %v2544_v50 = vld [vmem:[%s3193_s29 + $0x10] sm:$0xf]  ;;  %v2760_v52 = vld [vmem:[%s3193_s29 + $0x14] sm:$0xf]  ;;  %v2617_v53 = vor.u32 %v2779_v45, %v2616_v44  ;;  %v2546_v54 = vld [vmem:[%s3193_s29 + $0x18] sm:$0xf0]  ;;  %s2295_s28 = sadd.s32 (%p3094_p6), %s2754_s27, %s2753_s25 }
  0x59   : > { %656 = vperm.xlu2 %2918, %v582_v34   ;;  %v2776_v55 = vld [vmem:[%s3193_s29 + $0x94] sm:$0xf]  ;;  %v2610_v56 = vld [vmem:[%s3193_s29 + $0x98] sm:$0xf0]  ;;  %v2608_v58 = vld [vmem:[%s3193_s29 + $0x90] sm:$0xf]  ;;  %v2545_v60 = vor.u32 %v2761_v51, %v2544_v50  ;;  %v2549_v62 = vor.u32 %v2760_v52, %v2546_v54 }
  0x5a   : > { %1088 = vmatpush.bf16.msra.mxu0 %v2561_v33  ;;  %v583_v57 = vld [vmem:[%s4143_s2 + $0x58] sm:$0xff]  ;;  %v2613_v63 = vor.u32 %v2776_v55, %v2610_v56  ;;  %v2536_v0 = vld [vmem:[%s3193_s29] sm:$0xf]  ;;  %v2759_v1 = vld [vmem:[%s3193_s29 + $0x4] sm:$0xf0]  ;;  %s2755_s18 = sshll.u32 (%p3094_p6), %s2295_s28, 3 }
  0x5b   : > { %1266 = vmatpush.bf16.msra.mxu2 %v2565_v35  ;;  %v2777_v59 = vld [vmem:[%s3193_s29 + $0x94] sm:$0xf0]  ;;  %v2758_v2 = vld [vmem:[%s3193_s29 + $0x4] sm:$0xf]  ;;  %v2538_v4 = vld [vmem:[%s3193_s29 + $0x8] sm:$0xf0]  ;;  %v2537_v9 = vor.u32 %v2759_v1, %v2536_v0  ;;  %s2297_s16 = scalar_lea.vmem (%p3094_p6), %s4150_s9, %s2755_s18 }
  0x5c   : > { %1355 = vmatpush.bf16.msra.mxu3 %v2629_v36  ;;  %1177 = vmatpush.bf16.msra.mxu1 %v2625_v40  ;;  %v599_v61 = vld [vmem:[%s4143_s2 + $0xd8] sm:$0xff]  ;;  %v2609_v3 = vor.u32 %v2777_v59, %v2608_v58  ;;  %v2774_v5 = vld [vmem:[%s3193_s29 + $0x84] sm:$0xf]  ;;  %v2602_v6 = vld [vmem:[%s3193_s29 + $0x88] sm:$0xf0]  ;;  %v2541_v13 = vor.u32 %v2758_v2, %v2538_v4 }
  0x5d   : > { %v2600_v7 = vld [vmem:[%s3193_s29 + $0x80] sm:$0xf]  ;;  %v2775_v8 = vld [vmem:[%s3193_s29 + $0x84] sm:$0xf0]  ;;  %v2605_v14 = vor.u32 %v2774_v5, %v2602_v6  ;;  %v2790_v15 = vld [vmem:[%s4142_s1 + $0x4] sm:$0xf] }
  0x5e   : > { %736 = vperm.xlu1 %2917, %v598_v46   ;;  %1089 = vmatpush.bf16.msra.mxu0 %v2553_v47  ;;  %v2408_v10 = vld [vmem:[%s4142_s1] sm:$0xf]  ;;  %v2791_v11 = vld [vmem:[%s4142_s1 + $0x4] sm:$0xf0]  ;;  %v2410_v16 = vld [vmem:[%s4142_s1 + $0x8] sm:$0xf0]  ;;  %v2601_v17 = vor.u32 %v2775_v8, %v2600_v7 }
  0x5f   : > { %1267 = vmatpush.bf16.msra.mxu2 %v2557_v48  ;;  %661 = vperm.xlu0 %2916, %v583_v57   ;;  %v581_v12 = vld [vmem:[%s4143_s2 + $0x48] sm:$0xff]  ;;  %v2409_v18 = vor.u32 %v2791_v11, %v2408_v10  ;;  %v580_v19 = vld [vmem:[%s4143_s2 + $0x40] sm:$0xff]  ;;  %v2413_v20 = vor.u32 %v2790_v15, %v2410_v16  ;;  %v578_v22 = vld [vmem:[%s4143_s2 + $0x30] sm:$0xff] }
  0x60   : > { %1356 = vmatpush.bf16.msra.mxu3 %v2621_v49  ;;  %1178 = vmatpush.bf16.msra.mxu1 %v2617_v53  ;;  %v596_v21 = vld [vmem:[%s4143_s2 + $0xc0] sm:$0xff]  ;;  %v597_v23 = vld [vmem:[%s4143_s2 + $0xc8] sm:$0xff]  ;;  %v579_v24 = vld [vmem:[%s4143_s2 + $0x38] sm:$0xff] }
  0x61   : > { %741 = vperm.xlu2 %2918, %v599_v61   ;;  %v2416_v25 = vld [vmem:[%s4142_s1 + $0x10] sm:$0xf]  ;;  %v2793_v26 = vld [vmem:[%s4142_s1 + $0x14] sm:$0xf0]  ;;  %v2792_v28 = vld [vmem:[%s4142_s1 + $0x14] sm:$0xf] }
  0x62   : > { %1090 = vmatpush.bf16.msra.mxu0 %v2545_v60  ;;  %v595_v27 = vld [vmem:[%s4143_s2 + $0xb8] sm:$0xff]  ;;  %v2417_v30 = vor.u32 %v2793_v26, %v2416_v25  ;;  %v594_v31 = vld [vmem:[%s4143_s2 + $0xb0] sm:$0xff]  ;;  %v576_v33 = vld [vmem:[%s4143_s2 + $0x20] sm:$0xff] }
  0x63   : > { %1268 = vmatpush.bf16.msra.mxu2 %v2549_v62  ;;  %v2418_v29 = vld [vmem:[%s4142_s1 + $0x18] sm:$0xf0]  ;;  %v592_v34 = vld [vmem:[%s4143_s2 + $0xa0] sm:$0xff]  ;;  %v577_v35 = vld [vmem:[%s4143_s2 + $0x28] sm:$0xff] }
  0x64   : > { %1357 = vmatpush.bf16.msra.mxu3 %v2613_v63  ;;  %1179 = vmatpush.bf16.msra.mxu1 %v2609_v3  ;;  %v2421_v32 = vor.u32 %v2792_v28, %v2418_v29  ;;  %v593_v36 = vld [vmem:[%s4143_s2 + $0xa8] sm:$0xff]  ;;  %v2424_v37 = vld [vmem:[%s4142_s1 + $0x20] sm:$0xf]  ;;  %v575_v39 = vld [vmem:[%s4143_s2 + $0x18] sm:$0xff] }
  0x65   : > { %v2795_v38 = vld [vmem:[%s4142_s1 + $0x24] sm:$0xf0]  ;;  %v2794_v40 = vld [vmem:[%s4142_s1 + $0x24] sm:$0xf]  ;;  %v2426_v41 = vld [vmem:[%s4142_s1 + $0x28] sm:$0xf0] }
  0x66   : > { %651 = vperm.xlu1 %2917, %v581_v12   ;;  %1091 = vmatpush.bf16.msra.mxu0 %v2537_v9  ;;  %v2425_v42 = vor.u32 %v2795_v38, %v2424_v37  ;;  %v574_v43 = vld [vmem:[%s4143_s2 + $0x10] sm:$0xff]  ;;  %v2429_v44 = vor.u32 %v2794_v40, %v2426_v41  ;;  %v572_v46 = vld [vmem:[%s4143_s2] sm:$0xff]  ;;  %v573_v47 = vld [vmem:[%s4143_s2 + $0x8] sm:$0xff] }
  0x67   : > { %1269 = vmatpush.bf16.msra.mxu2 %v2541_v13  ;;  %646 = vperm.xlu0 %2916, %v580_v19   ;;  %v590_v45 = vld [vmem:[%s4143_s2 + $0x90] sm:$0xff]  ;;  %v2797_v49 = vld [vmem:[%s4142_s1 + $0x34] sm:$0xf0]  ;;  %v2434_v51 = vld [vmem:[%s4142_s1 + $0x38] sm:$0xf0] }
  0x68   : > { %1358 = vmatpush.bf16.msra.mxu3 %v2605_v14  ;;  %1180 = vmatpush.bf16.msra.mxu1 %v2601_v17  ;;  %v2432_v48 = vld [vmem:[%s4142_s1 + $0x30] sm:$0xf]  ;;  %v2796_v50 = vld [vmem:[%s4142_s1 + $0x34] sm:$0xf]  ;;  %v2440_v54 = vld [vmem:[%s4142_s1 + $0x40] sm:$0xf] }
  0x69   : > { %1092 = vmatmul.bf16.vlgmr.msra.gmra.mxu0 %v2409_v18  ;;  %726 = vperm.xlu2 %2918, %v596_v21   ;;  %v2433_v52 = vor.u32 %v2797_v49, %v2432_v48  ;;  %v2437_v53 = vor.u32 %v2796_v50, %v2434_v51  ;;  %v2799_v55 = vld [vmem:[%s4142_s1 + $0x44] sm:$0xf0]  ;;  %v2798_v57 = vld [vmem:[%s4142_s1 + $0x44] sm:$0xf]  ;;  %v2442_v58 = vld [vmem:[%s4142_s1 + $0x48] sm:$0xf0] }
  0x6a   : > { %1270 = vmatmul.bf16.vlgmr.msra.gmra.mxu2 %v2409_v18  ;;  %v2441_v59 = vor.u32 %v2799_v55, %v2440_v54  ;;  %v2445_v60 = vor.u32 %v2798_v57, %v2442_v58  ;;  %v2448_v62 = vld [vmem:[%s4142_s1 + $0x50] sm:$0xf]  ;;  %v2801_v63 = vld [vmem:[%s4142_s1 + $0x54] sm:$0xf0]  ;;  %v2800_v0 = vld [vmem:[%s4142_s1 + $0x54] sm:$0xf] }
  0x6b   : > { %1359 = vmatmul.bf16.vlgmr.msra.gmra.mxu3 %v2413_v20  ;;  %1181 = vmatmul.bf16.vlgmr.msra.gmra.mxu1 %v2413_v20  ;;  %v2450_v1 = vld [vmem:[%s4142_s1 + $0x58] sm:$0xf0]  ;;  %v2449_v3 = vor.u32 %v2801_v63, %v2448_v62  ;;  %v2456_v10 = vld [vmem:[%s4142_s1 + $0x60] sm:$0xf]  ;;  %v2803_v11 = vld [vmem:[%s4142_s1 + $0x64] sm:$0xf0] }
  0x6c   : > { %v2453_v4 = vor.u32 %v2800_v0, %v2450_v1  ;;  %v2802_v12 = vld [vmem:[%s4142_s1 + $0x64] sm:$0xf]  ;;  %v2458_v13 = vld [vmem:[%s4142_s1 + $0x68] sm:$0xf0]  ;;  %v2457_v15 = vor.u32 %v2803_v11, %v2456_v10  ;;  %v591_v20 = vld [vmem:[%s4143_s2 + $0x98] sm:$0xff] }
  0x6d   : > { %v2461_v16 = vor.u32 %v2802_v12, %v2458_v13  ;;  %v2804_v25 = vld [vmem:[%s4142_s1 + $0x74] sm:$0xf]  ;;  %v2466_v26 = vld [vmem:[%s4142_s1 + $0x78] sm:$0xf0]  ;;  %v2472_v38 = vld [vmem:[%s4142_s1 + $0x80] sm:$0xf] }
  0x6e   : > { %636 = vperm.xlu1 %2917, %v578_v22   ;;  %v2469_v29 = vor.u32 %v2804_v25, %v2466_v26  ;;  %v2806_v40 = vld [vmem:[%s4142_s1 + $0x84] sm:$0xf]  ;;  %v2474_v41 = vld [vmem:[%s4142_s1 + $0x88] sm:$0xf0]  ;;  %v1563_v57 = vld [vmem:[%s4145_s4 + $0x58] sm:$0xff] }
  0x6f   : > { %731 = vperm.xlu0 %2916, %v597_v23   ;;  %v2464_v23 = vld [vmem:[%s4142_s1 + $0x70] sm:$0xf]  ;;  %v1561_v55 = vld [vmem:[%s4145_s4 + $0x48] sm:$0xff]  ;;  %v2809_v1 = vld [vmem:[%s4142_s1 + $0x94] sm:$0xf0] }
  0x70   : > { %v2480_v0 = vld [vmem:[%s4142_s1 + $0x90] sm:$0xf] }
  0x71   : > { %641 = vperm.xlu2 %2918, %v579_v24   ;;  %v2805_v24 = vld [vmem:[%s4142_s1 + $0x74] sm:$0xf0]  ;;  %v2481_v12 = vor.u32 %v2809_v1, %v2480_v0 }
  0x72   : > { %v2465_v28 = vor.u32 %v2805_v24, %v2464_v23  ;;  %v1558_v23 = vld [vmem:[%s4145_s4 + $0x30] sm:$0xff] }
  0x76   : > { %721 = vperm.xlu1 %2917, %v595_v27  }
  0x77   : > { %716 = vperm.xlu0 %2916, %v594_v31  }
  0x79   : > { %1097 = vmatmul.bf16.gmra.mxu0 %v2417_v30  ;;  %626 = vperm.xlu2 %2918, %v576_v33  }
  0x7a   : > { %1275 = vmatmul.bf16.gmra.mxu2 %v2417_v30  ;;  %v588_v30 = vld [vmem:[%s4143_s2 + $0x80] sm:$0xff] }
  0x7b   : > { %1364 = vmatmul.bf16.gmra.mxu3 %v2421_v32  ;;  %1186 = vmatmul.bf16.gmra.mxu1 %v2421_v32 }
  0x7e   : > { %706 = vperm.xlu1 %2917, %v592_v34   ;;  %v589_v34 = vld [vmem:[%s4143_s2 + $0x88] sm:$0xff] }
  0x7f   : > { %631 = vperm.xlu0 %2916, %v577_v35   ;;  %v1567_v35 = vld [vmem:[%s4145_s4 + $0x78] sm:$0xff] }
  0x81   : > { %711 = vperm.xlu2 %2918, %v593_v36  }
  0x86   : > { %621 = vperm.xlu1 %2917, %v575_v39   ;;  %v2807_v39 = vld [vmem:[%s4142_s1 + $0x84] sm:$0xf0] }
  0x87   : > { %616 = vperm.xlu0 %2916, %v574_v43   ;;  %v2473_v43 = vor.u32 %v2807_v39, %v2472_v38 }
  0x89   : > { %1102 = vmatmul.bf16.gmra.mxu0 %v2425_v42  ;;  %696 = vperm.xlu2 %2918, %v590_v45   ;;  %v2477_v45 = vor.u32 %v2806_v40, %v2474_v41  ;;  %v1555_v41 = vld [vmem:[%s4145_s4 + $0x18] sm:$0xff] }
  0x8a   : > { %1280 = vmatmul.bf16.gmra.mxu2 %v2425_v42 }
  0x8b   : > { %1369 = vmatmul.bf16.gmra.mxu3 %v2429_v44  ;;  %1191 = vmatmul.bf16.gmra.mxu1 %v2429_v44 }
  0x8e   : > { %606 = vperm.xlu1 %2917, %v572_v46   ;;  %v1562_v46 = vld [vmem:[%s4145_s4 + $0x50] sm:$0xff] }
  0x8f   : > { %701 = vperm.xlu0 %2916, %v591_v20   ;;  %v1556_v20 = vld [vmem:[%s4145_s4 + $0x20] sm:$0xff] }
  0x91   : > { %611 = vperm.xlu2 %2918, %v573_v47   ;;  %v1564_v47 = vld [vmem:[%s4145_s4 + $0x60] sm:$0xff] }
  0x96   : > { %691 = vperm.xlu1 %2917, %v589_v34  }
  0x97   : > { %686 = vperm.xlu0 %2916, %v588_v30   ;;  %v1566_v30 = vld [vmem:[%s4145_s4 + $0x70] sm:$0xff] }
  0x99   : > { %1107 = vmatmul.bf16.gmra.mxu0 %v2433_v52  ;;  %1640 = vperm.xlu2 %2918, %v1566_v30   ;;  %v1552_v30 = vld [vmem:[%s4145_s4] sm:$0xff] }
  0x9a   : > { %1285 = vmatmul.bf16.gmra.mxu2 %v2433_v52 }
  0x9b   : > { %1374 = vmatmul.bf16.gmra.mxu3 %v2437_v53  ;;  %1196 = vmatmul.bf16.gmra.mxu1 %v2437_v53 }
  0x9e   : > { %1630 = vperm.xlu1 %2917, %v1564_v47  }
  0x9f   : > { %1645 = vperm.xlu0 %2916, %v1567_v35  }
  0xa2   : > { %v3391_v56 = vpop.permute.xlu2 %666 }
  0xa6   : > { %1625 = vperm.xlu1 %2917, %v1563_v57  }
  0xa7   : > { %1620 = vperm.xlu0 %2916, %v1562_v46  }
  0xa9   : > { %1112 = vmatmul.bf16.gmra.mxu0 %v2441_v59 }
  0xaa   : > { %1290 = vmatmul.bf16.gmra.mxu2 %v2441_v59 }
  0xab   : > { %1379 = vmatmul.bf16.gmra.mxu3 %v2445_v60  ;;  %1201 = vmatmul.bf16.gmra.mxu1 %v2445_v60  ;;  %v3399_v61 = vpop.permute.xlu2 %671 }
  0xae   : > { %1600 = vperm.xlu1 %2917, %v1558_v23  }
  0xaf   : > { %1615 = vperm.xlu0 %2916, %v1561_v55  }
  0xb3   : > { %v3413_v2 = vpop.permute.xlu2 %656 }
  0xb7   : > { %1590 = vperm.xlu0 %2916, %v1556_v20  }
  0xb8   : > { %v3415_v5 = vpop.permute.xlu1 %756  ;;  %v3417_v6 = vpop.permute.xlu0 %676 }
  0xb9   : > { %1117 = vmatmul.bf16.gmra.mxu0 %v2449_v3 }
  0xba   : > { %1295 = vmatmul.bf16.gmra.mxu2 %v2449_v3  ;;  %v2808_v3 = vld [vmem:[%s4142_s1 + $0x94] sm:$0xf] }
  0xbb   : > { %1384 = vmatmul.bf16.gmra.mxu3 %v2453_v4  ;;  %1206 = vmatmul.bf16.gmra.mxu1 %v2453_v4  ;;  %v3419_v7 = vpop.permute.xlu2 %741  ;;  %v2482_v4 = vld [vmem:[%s4142_s1 + $0x98] sm:$0xf0] }
  0xbc   : > { %4163 = vst [vmem:[#allocation6_spill] sm:$0xff] %v3419_v7 }
  0xbf   : > { %1585 = vperm.xlu0 %2916, %v1555_v41   ;;  %v1560_v41 = vld [vmem:[%s4145_s4 + $0x40] sm:$0xff] }
  0xc0   : > { %v3421_v8 = vpop.permute.xlu1 %761 }
  0xc1   : > { %4164 = vst [vmem:[#allocation7_spill] sm:$0xff] %v3421_v8  ;;  %v3423_v9 = vpop.permute.xlu0 %681 }
  0xc3   : > { %v3437_v14 = vpop.permute.xlu2 %726 }
  0xc8   : > { %v3439_v17 = vpop.permute.xlu1 %751 }
  0xc9   : > { %1122 = vmatmul.bf16.gmra.mxu0 %v2457_v15  ;;  %v3441_v18 = vpop.permute.xlu0 %746 }
  0xca   : > { %1300 = vmatmul.bf16.gmra.mxu2 %v2457_v15 }
  0xcb   : > { %1389 = vmatmul.bf16.gmra.mxu3 %v2461_v16  ;;  %1211 = vmatmul.bf16.gmra.mxu1 %v2461_v16  ;;  %v3443_v19 = vpop.permute.xlu2 %641  ;;  %v2485_v16 = vor.u32 %v2808_v3, %v2482_v4 }
  0xd0   : > { %v3448_v21 = vpop.permute.xlu1 %736 }
  0xd1   : > { %4165 = vst [vmem:[#allocation8_spill] sm:$0xff] %v3448_v21  ;;  %v3450_v22 = vpop.permute.xlu0 %661 }
  0xd3   : > { %v3464_v27 = vpop.permute.xlu2 %626 }
  0xd8   : > { %v3469_v31 = vpop.permute.xlu1 %651 }
  0xd9   : > { %1127 = vmatmul.bf16.gmra.mxu0 %v2465_v28  ;;  %v3471_v32 = vpop.permute.xlu0 %646 }
  0xda   : > { %1305 = vmatmul.bf16.gmra.mxu2 %v2465_v28 }
  0xdb   : > { %1394 = vmatmul.bf16.gmra.mxu3 %v2469_v29  ;;  %1216 = vmatmul.bf16.gmra.mxu1 %v2469_v29  ;;  %v3473_v33 = vpop.permute.xlu2 %711 }
  0xdc   : > { %4166 = vst [vmem:[#allocation9_spill] sm:$0xff] %v3473_v33 }
  0xe0   : > { %v3481_v36 = vpop.permute.xlu1 %636 }
  0xe1   : > { %v3483_v37 = vpop.permute.xlu0 %731 }
  0xe2   : > { %4167 = vst [vmem:[#allocation10_spill] sm:$0xff] %v3483_v37 }
  0xe3   : > { %v3497_v42 = vpop.permute.xlu2 %696 }
  0xe6   : > { %v3499_v44 = vpop.f32.mrf.mxu0 }
  0xe8   : > { %v3507_v48 = vpop.permute.xlu1 %721  ;;  %v3509_v49 = vpop.f32.mrf.mxu1 }
  0xe9   : > { %4168 = vst [vmem:[#allocation11_spill] sm:$0xff] %v3507_v48  ;;  %1132 = vmatmul.bf16.gmra.mxu0 %v2473_v43  ;;  %v3511_v50 = vpop.permute.xlu0 %716 }
  0xea   : > { %1310 = vmatmul.bf16.gmra.mxu2 %v2473_v43  ;;  %v1557_v43 = vld [vmem:[%s4145_s4 + $0x28] sm:$0xff] }
  0xeb   : > { %1399 = vmatmul.bf16.gmra.mxu3 %v2477_v45  ;;  %1221 = vmatmul.bf16.gmra.mxu1 %v2477_v45  ;;  %v612_v51 = vpop.permute.xlu2 %611 }
  0xec   : > { %1595 = vperm.xlu1 %2917, %v1557_v43  }
  0xed   : > { %v1271_v52 = vpop.f32.mrf.mxu2 }
  0xee   : > { %v1360_v53 = vpop.f32.mrf.mxu3  ;;  %v1095_v54 = vpop.f32.mrf.mxu0 }
  0xef   : > { %v1096_v58 = vadd.f32 %v1095_v54, %v612_v51 }
  0xf0   : > { %v3519_v59 = vpop.permute.xlu1 %706  ;;  %v1184_v60 = vpop.f32.mrf.mxu1 }
  0xf1   : > { %v3521_v62 = vadd.f32 %v1184_v60, %v1096_v58  ;;  %v3523_v63 = vpop.permute.xlu0 %631  ;;  %v2488_v58 = vld [vmem:[%s4142_s1 + $0xa0] sm:$0xf]  ;;  %v2811_v60 = vld [vmem:[%s4142_s1 + $0xa4] sm:$0xf0] }
  0xf4   : > { %1570 = vperm.xlu1 %2917, %v1552_v30  }
  0xf5   : > { %v1273_v10 = vpop.f32.mrf.mxu2 }
  0xf6   : > { %v1362_v11 = vpop.f32.mrf.mxu3  ;;  %v1274_v13 = vadd.f32 %v1273_v10, %v612_v51  ;;  %v1098_v15 = vpop.f32.mrf.mxu0  ;;  %v2810_v10 = vld [vmem:[%s4142_s1 + $0xa4] sm:$0xf] }
  0xf8   : > { %v1363_v24 = vadd.f32 %v1362_v11, %v1274_v13  ;;  %v622_v25 = vpop.permute.xlu1 %621  ;;  %v1187_v26 = vpop.f32.mrf.mxu1  ;;  %v1565_v11 = vld [vmem:[%s4145_s4 + $0x68] sm:$0xff] }
  0xf9   : > { %1137 = vmatmul.bf16.gmra.mxu0 %v2481_v12  ;;  %v617_v28 = vpop.permute.xlu0 %616  ;;  %1635 = vperm.xlu2 %2918, %v1565_v11  }
  0xfa   : > { %1315 = vmatmul.bf16.gmra.mxu2 %v2481_v12  ;;  %v1099_v29 = vadd.f32 %v1098_v15, %v617_v28  ;;  %v1442_v12 = vmax.f32 %v3521_v62, 0.0  ;;  %v1443_v13 = vmax.f32 %v1363_v24, 0.0 }
  0xfb   : > { %1404 = vmatmul.bf16.gmra.mxu3 %v2485_v16  ;;  %1226 = vmatmul.bf16.gmra.mxu1 %v2485_v16 }
  0xfc   : > { %v1188_v34 = vadd.f32 %v1187_v26, %v1099_v29  ;;  %v1986_v29 = vld [vmem:[%s4147_s6 + $0x30] sm:$0xff] }
  0xfd   : > { %v1276_v35 = vpop.f32.mrf.mxu2  ;;  %2020 = vperm.xlu0 %2916, %v1986_v29  }
  0xfe   : > { %v1365_v38 = vpop.f32.mrf.mxu3  ;;  %v1277_v39 = vadd.f32 %v1276_v35, %v617_v28  ;;  %v1100_v40 = vpop.f32.mrf.mxu0  ;;  %v1444_v0 = vmax.f32 %v1188_v34, 0.0 }
  0xff   : > { %v1101_v45 = vadd.f32 %v1100_v40, %v622_v25 }
 0x100   : > { %v1366_v46 = vadd.f32 %v1365_v38, %v1277_v39  ;;  %v607_v47 = vpop.permute.xlu1 %606  ;;  %v1189_v51 = vpop.f32.mrf.mxu1 }
 0x101   : > { %v1094_v54 = vadd.f32 %v3499_v44, %v607_v47  ;;  %v1272_v55 = vadd.f32 %v1271_v52, %v607_v47  ;;  %v1190_v57 = vadd.f32 %v1189_v51, %v1101_v45  ;;  %v2490_v44 = vld [vmem:[%s4142_s1 + $0xa8] sm:$0xf0]  ;;  %v2489_v52 = vor.u32 %v2811_v60, %v2488_v58  ;;  %1610 = vperm.xlu2 %2918, %v1560_v41  }
 0x102   : > { %v2493_v28 = vor.u32 %v2810_v10, %v2490_v44  ;;  %v1445_v39 = vmax.f32 %v1366_v46, 0.0  ;;  %v1985_v46 = vld [vmem:[%s4147_s6 + $0x28] sm:$0xff]  ;;  %v2812_v10 = vld [vmem:[%s4142_s1 + $0xb4] sm:$0xf]  ;;  %v2498_v44 = vld [vmem:[%s4142_s1 + $0xb8] sm:$0xf0] }
 0x103   : > { %v1183_v1 = vadd.f32 %v3509_v49, %v1094_v54  ;;  %v1361_v3 = vadd.f32 %v1360_v53, %v1272_v55  ;;  %v1446_v4 = vmax.f32 %v1190_v57, 0.0  ;;  %v1987_v55 = vld [vmem:[%s4147_s6 + $0x38] sm:$0xff] }
 0x104   : > { %2025 = vperm.xlu1 %2917, %v1987_v55  }
 0x105   : > { %v1278_v15 = vpop.f32.mrf.mxu2  ;;  %v3570_v53 = vpack.c.bf16 %v1446_v4, %v1444_v0  ;;  %v1440_v16 = vmax.f32 %v1183_v1, 0.0  ;;  %v1441_v20 = vmax.f32 %v1361_v3, 0.0  ;;  %2015 = vperm.xlu0 %2916, %v1985_v46   ;;  %v2813_v3 = vld [vmem:[%s4142_s1 + $0xb4] sm:$0xf0] }
 0x106   : > { %v1367_v49 = vpop.f32.mrf.mxu3  ;;  %v1279_v23 = vadd.f32 %v1278_v15, %v622_v25  ;;  %v1103_v26 = vpop.f32.mrf.mxu0 }
 0x107   : > { %v1104_v62 = vadd.f32 %v1103_v26, %v3464_v27  ;;  %v3579_v24 = vpack.c.bf16 %v1442_v12, %v1440_v16  ;;  %v3581_v34 = vpack.c.bf16 %v1443_v13, %v1441_v20  ;;  %v2501_v20 = vor.u32 %v2812_v10, %v2498_v44  ;;  %v1982_v26 = vld [vmem:[%s4147_s6 + $0x10] sm:$0xff] }
 0x108   : > { %v1368_v35 = vadd.f32 %v1367_v49, %v1279_v23  ;;  %v1192_v25 = vpop.f32.mrf.mxu1  ;;  %v1980_v23 = vld [vmem:[%s4147_s6] sm:$0xff] }
 0x109   : > { %v1193_v38 = vadd.f32 %v1192_v25, %v1104_v62  ;;  %1142 = vmatmul.bf16.gmra.mxu0 %v2489_v52  ;;  %v1554_v25 = vld [vmem:[%s4145_s4 + $0x10] sm:$0xff] }
 0x10a   : > { %v1447_v40 = vmax.f32 %v1368_v35, 0.0  ;;  %1320 = vmatmul.bf16.gmra.mxu2 %v2489_v52  ;;  %v1559_v52 = vld [vmem:[%s4145_s4 + $0x38] sm:$0xff] }
 0x10b   : > { %1409 = vmatmul.bf16.gmra.mxu3 %v2493_v28  ;;  %1231 = vmatmul.bf16.gmra.mxu1 %v2493_v28  ;;  %v1448_v0 = vmax.f32 %v1193_v38, 0.0 }
 0x10c   : > { %v3586_v43 = vpack.c.bf16 %v1447_v40, %v1445_v39  ;;  %1605 = vperm.xlu2 %2918, %v1559_v52   ;;  %2000 = vperm.xlu1 %2917, %v1982_v26  }
 0x10d   : > { %v1281_v45 = vpop.f32.mrf.mxu2  ;;  %1990 = vperm.xlu0 %2916, %v1980_v23  }
 0x10e   : > { %v1370_v47 = vpop.f32.mrf.mxu3  ;;  %v1282_v51 = vadd.f32 %v1281_v45, %v3464_v27  ;;  %v1105_v54 = vpop.f32.mrf.mxu0  ;;  %v2496_v27 = vld [vmem:[%s4142_s1 + $0xb0] sm:$0xf] }
 0x10f   : > { %v1106_v57 = vadd.f32 %v1105_v54, %v3523_v63  ;;  %v2497_v13 = vor.u32 %v2813_v3, %v2496_v27  ;;  %v2506_v27 = vld [vmem:[%s4142_s1 + $0xc8] sm:$0xf0] }
 0x110   : > { %v1371_v58 = vadd.f32 %v1370_v47, %v1282_v51  ;;  %v1194_v60 = vpop.f32.mrf.mxu1  ;;  %v2137_v47 = vld [vmem:[%s4149_s8 + $0x8] sm:$0x3] }
 0x111   : > { %v1195_v1 = vadd.f32 %v1194_v60, %v1106_v57  ;;  %v1981_v51 = vld [vmem:[%s4147_s6 + $0x8] sm:$0xff] }
 0x112   : > { %v1449_v35 = vmax.f32 %v1371_v58, 0.0  ;;  %v2815_v60 = vld [vmem:[%s4142_s1 + $0xc4] sm:$0xf0] }
 0x113   : > { %v1450_v4 = vmax.f32 %v1195_v1, 0.0  ;;  %v2814_v1 = vld [vmem:[%s4142_s1 + $0xc4] sm:$0xf]  ;;  %v1553_v3 = vld [vmem:[%s4145_s4 + $0x8] sm:$0xff] }
 0x114   : > { %1580 = vperm.xlu2 %2918, %v1554_v25   ;;  %1995 = vperm.xlu1 %2917, %v1981_v51  }
 0x115   : > { %v1283_v11 = vpop.f32.mrf.mxu2  ;;  %v3611_v15 = vpack.c.bf16 %v1450_v4, %v1448_v0  ;;  %2145 = vperm.xlu0 %2916, %v2137_v47   ;;  %v1983_v47 = vld [vmem:[%s4147_s6 + $0x18] sm:$0xff] }
 0x116   : > { %v1372_v12 = vpop.f32.mrf.mxu3  ;;  %v1284_v49 = vadd.f32 %v1283_v11, %v3523_v63  ;;  %v1108_v16 = vpop.f32.mrf.mxu0 }
 0x117   : > { %v1109_v28 = vadd.f32 %v1108_v16, %v3481_v36 }
 0x118   : > { %v1373_v29 = vadd.f32 %v1372_v12, %v1284_v49  ;;  %v1197_v30 = vpop.f32.mrf.mxu1 }
 0x119   : > { %v1198_v62 = vadd.f32 %v1197_v30, %v1109_v28  ;;  %1147 = vmatmul.bf16.gmra.mxu0 %v2497_v13 }
 0x11a   : > { %v1451_v63 = vmax.f32 %v1373_v29, 0.0  ;;  %1325 = vmatmul.bf16.gmra.mxu2 %v2497_v13  ;;  %v2509_v13 = vor.u32 %v2814_v1, %v2506_v27 }
 0x11b   : > { %1414 = vmatmul.bf16.gmra.mxu3 %v2501_v20  ;;  %1236 = vmatmul.bf16.gmra.mxu1 %v2501_v20  ;;  %v1452_v57 = vmax.f32 %v1198_v62, 0.0 }
 0x11c   : > { %v3624_v38 = vpack.c.bf16 %v1451_v63, %v1449_v35  ;;  %1575 = vperm.xlu2 %2918, %v1553_v3   ;;  %v2520_v3 = vld [vmem:[%s4142_s1 + $0xe0] sm:$0xf] }
 0x11d   : > { %v1286_v39 = vpop.f32.mrf.mxu2 }
 0x11e   : > { %v1375_v40 = vpop.f32.mrf.mxu3  ;;  %v1287_v41 = vadd.f32 %v1286_v39, %v3481_v36  ;;  %v1110_v45 = vpop.f32.mrf.mxu0  ;;  %v2504_v36 = vld [vmem:[%s4142_s1 + $0xc0] sm:$0xf] }
 0x11f   : > { %v1111_v54 = vadd.f32 %v1110_v45, %v3443_v19  ;;  %v2505_v44 = vor.u32 %v2815_v60, %v2504_v36  ;;  %v2816_v45 = vld [vmem:[%s4142_s1 + $0xd4] sm:$0xf]  ;;  %v2136_v36 = vld [vmem:[%s4149_s8] sm:$0xff] }
 0x120   : > { %v1376_v46 = vadd.f32 %v1375_v40, %v1287_v41  ;;  %v1199_v55 = vpop.f32.mrf.mxu1  ;;  %v2512_v40 = vld [vmem:[%s4142_s1 + $0xd0] sm:$0xf]  ;;  %v2817_v41 = vld [vmem:[%s4142_s1 + $0xd4] sm:$0xf0] }
 0x121   : > { %v1200_v58 = vadd.f32 %v1199_v55, %v1111_v54 }
 0x122   : > { %v1453_v26 = vmax.f32 %v1376_v46, 0.0  ;;  %v2513_v46 = vor.u32 %v2817_v41, %v2512_v40  ;;  %v2820_v40 = vld [vmem:[%s4142_s1 + $0xf4] sm:$0xf]  ;;  %v2530_v41 = vld [vmem:[%s4142_s1 + $0xf8] sm:$0xf0] }
 0x123   : > { %v1454_v0 = vmax.f32 %v1200_v58, 0.0 }
 0x125   : > { %v1288_v4 = vpop.f32.mrf.mxu2  ;;  %v3649_v52 = vpack.c.bf16 %v1454_v0, %v1452_v57 }
 0x126   : > { %v1377_v10 = vpop.f32.mrf.mxu3  ;;  %v1289_v11 = vadd.f32 %v1288_v4, %v3443_v19  ;;  %v1113_v12 = vpop.f32.mrf.mxu0  ;;  %v1984_v19 = vld [vmem:[%s4147_s6 + $0x20] sm:$0xff]  ;;  %v2819_v4 = vld [vmem:[%s4142_s1 + $0xe4] sm:$0xf0] }
 0x127   : > { %v1114_v49 = vadd.f32 %v1113_v12, %v3471_v32  ;;  %2010 = vperm.xlu2 %2918, %v1984_v19  }
 0x128   : > { %v1378_v16 = vadd.f32 %v1377_v10, %v1289_v11  ;;  %v1202_v20 = vpop.f32.mrf.mxu1  ;;  %v2818_v10 = vld [vmem:[%s4142_s1 + $0xe4] sm:$0xf] }
 0x129   : > { %v3653_v23 = vadd.f32 %v1202_v20, %v1114_v49  ;;  %1152 = vmatmul.bf16.gmra.mxu0 %v2505_v44 }
 0x12a   : > { %v1455_v28 = vmax.f32 %v1378_v16, 0.0  ;;  %1330 = vmatmul.bf16.gmra.mxu2 %v2505_v44  ;;  %v2522_v44 = vld [vmem:[%s4142_s1 + $0xe8] sm:$0xf0] }
 0x12b   : > { %1419 = vmatmul.bf16.gmra.mxu3 %v2509_v13  ;;  %1241 = vmatmul.bf16.gmra.mxu1 %v2509_v13  ;;  %v2521_v13 = vor.u32 %v2819_v4, %v2520_v3  ;;  %v2525_v16 = vor.u32 %v2818_v10, %v2522_v44  ;;  %v3722_v4 = vpop.permute.xlu0 %701 }
 0x12c   : > { %v3655_v29 = vpack.c.bf16 %v1455_v28, %v1453_v26  ;;  %4169 = vst [vmem:[#allocation12_spill] sm:$0xff] %v3722_v4 }
 0x12d   : > { %v1291_v30 = vpop.f32.mrf.mxu2 }
 0x12e   : > { %v1380_v62 = vpop.f32.mrf.mxu3  ;;  %v1292_v35 = vadd.f32 %v1291_v30, %v3471_v32  ;;  %v3661_v63 = vpop.f32.mrf.mxu0  ;;  %v2514_v32 = vld [vmem:[%s4142_s1 + $0xd8] sm:$0xf0] }
 0x12f   : > { %2005 = vperm.xlu2 %2918, %v1983_v47   ;;  %v2517_v57 = vor.u32 %v2816_v45, %v2514_v32 }
 0x130   : > { %v3663_v25 = vadd.f32 %v1380_v62, %v1292_v35  ;;  %v3665_v39 = vpop.f32.mrf.mxu1  ;;  %v2528_v62 = vld [vmem:[%s4142_s1 + $0xf0] sm:$0xf]  ;;  %v2821_v35 = vld [vmem:[%s4142_s1 + $0xf4] sm:$0xf0] }
 0x131   : > { %v2529_v47 = vor.u32 %v2821_v35, %v2528_v62 }
 0x135   : > { %v3682_v51 = vpop.f32.mrf.mxu2 }
 0x136   : > { %v3684_v54 = vpop.f32.mrf.mxu3  ;;  %v1118_v55 = vpop.f32.mrf.mxu0 }
 0x137   : > { %2140 = vperm.xlu2 %2918, %v2136_v36   ;;  %v1119_v35 = vadd.f32 %v1118_v55, %v3413_v2 }
 0x138   : > { %v1207_v58 = vpop.f32.mrf.mxu1 }
 0x139   : > { %1157 = vmatmul.bf16.gmra.mxu0 %v2513_v46 }
 0x13a   : > { %1335 = vmatmul.bf16.gmra.mxu2 %v2513_v46 }
 0x13b   : > { %1424 = vmatmul.bf16.gmra.mxu3 %v2517_v57  ;;  %1246 = vmatmul.bf16.gmra.mxu1 %v2517_v57  ;;  %v2533_v57 = vor.u32 %v2820_v40, %v2530_v41 }
 0x13d   : > { %v3689_v60 = vpop.f32.mrf.mxu2 }
 0x13e   : > { %v3691_v0 = vpop.f32.mrf.mxu3  ;;  %v1120_v1 = vpop.f32.mrf.mxu0 }
 0x13f   : > { %v1121_v40 = vadd.f32 %v1120_v1, %v3450_v22 }
 0x140   : > { %v1209_v27 = vpop.f32.mrf.mxu1 }
 0x141   : > { %v1210_v21 = vadd.f32 %v1209_v27, %v1121_v40 }
 0x145   : > { %v3705_v11 = vpop.f32.mrf.mxu2 }
 0x146   : > { %v3707_v12 = vpop.f32.mrf.mxu3  ;;  %v1123_v49 = vpop.f32.mrf.mxu0 }
 0x147   : > { %v1124_v10 = vadd.f32 %v1123_v49, %v3391_v56 }
 0x148   : > { %v1212_v20 = vpop.f32.mrf.mxu1 }
 0x149   : > { %1162 = vmatmul.bf16.gmra.mxu0 %v2521_v13 }
 0x14a   : > { %1340 = vmatmul.bf16.gmra.mxu2 %v2521_v13 }
 0x14b   : > { %1429 = vmatmul.bf16.gmra.mxu3 %v2525_v16  ;;  %1251 = vmatmul.bf16.gmra.mxu1 %v2525_v16 }
 0x14d   : > { %v1301_v26 = vpop.f32.mrf.mxu2 }
 0x14e   : > { %v1390_v28 = vpop.f32.mrf.mxu3  ;;  %v1125_v19 = vpop.f32.mrf.mxu0 }
 0x14f   : > { %v1126_v44 = vadd.f32 %v1125_v19, %v3399_v61  ;;  %v1116_v19 = vadd.f32 %v3661_v63, %v3469_v31 }
 0x150   : > { %v1214_v30 = vpop.f32.mrf.mxu1 }
 0x151   : > { %v1205_v63 = vadd.f32 %v3665_v39, %v1116_v19  ;;  %v1294_v39 = vadd.f32 %v3682_v51, %v3469_v31 }
 0x153   : > { %v1383_v31 = vadd.f32 %v3684_v54, %v1294_v39 }
 0x155   : > { %v1303_v45 = vpop.f32.mrf.mxu2 }
 0x156   : > { %v1392_v32 = vpop.f32.mrf.mxu3  ;;  %v1128_v46 = vpop.f32.mrf.mxu0 }
 0x157   : > { %v1129_v3 = vadd.f32 %v1128_v46, %v3417_v6  ;;  %v1215_v46 = vadd.f32 %v1214_v30, %v1126_v44 }
 0x158   : > { %v1217_v36 = vpop.f32.mrf.mxu1 }
 0x159   : > { %1167 = vmatmul.bf16.gmra.mxu0 %v2529_v47  ;;  %v1218_v13 = vadd.f32 %v1217_v36, %v1129_v3  ;;  %v1208_v36 = vadd.f32 %v1207_v58, %v1119_v35  ;;  %v1304_v3 = vadd.f32 %v1303_v45, %v3399_v61  ;;  %v1466_v7 = vmax.f32 %v1215_v46, 0.0 }
 0x15a   : > { %1345 = vmatmul.bf16.gmra.mxu2 %v2529_v47  ;;  %v1213_v47 = vadd.f32 %v1212_v20, %v1124_v10  ;;  %v1302_v20 = vadd.f32 %v1301_v26, %v3391_v56  ;;  %v1299_v61 = vadd.f32 %v3705_v11, %v3450_v22  ;;  %v1297_v56 = vadd.f32 %v3689_v60, %v3413_v2 }
 0x15b   : > { %1434 = vmatmul.bf16.gmra.mxu3 %v2533_v57  ;;  %1256 = vmatmul.bf16.gmra.mxu1 %v2533_v57  ;;  %v1468_v57 = vmax.f32 %v1218_v13, 0.0  ;;  %v1393_v58 = vadd.f32 %v1392_v32, %v1304_v3  ;;  %v1460_v13 = vmax.f32 %v1208_v36, 0.0  ;;  %v1456_v32 = vmax.f32 %v3653_v23, 0.0 }
 0x15c   : > { %v1388_v22 = vadd.f32 %v3707_v12, %v1299_v61  ;;  %v1457_v3 = vmax.f32 %v3663_v25, 0.0 }
 0x15d   : > { %v1306_v16 = vpop.f32.mrf.mxu2  ;;  %v1467_v11 = vmax.f32 %v1393_v58, 0.0 }
 0x15e   : > { %v1395_v33 = vpop.f32.mrf.mxu3  ;;  %v1130_v48 = vpop.f32.mrf.mxu0  ;;  %v1307_v4 = vadd.f32 %v1306_v16, %v3417_v6  ;;  %v1462_v16 = vmax.f32 %v1210_v21, 0.0  ;;  %v1458_v21 = vmax.f32 %v1205_v63, 0.0  ;;  %v1463_v51 = vmax.f32 %v1388_v22, 0.0 }
 0x15f   : > { %v1131_v62 = vadd.f32 %v1130_v48, %v3423_v9  ;;  %v1464_v48 = vmax.f32 %v1213_v47, 0.0  ;;  %v687_v6 = vpop.permute.xlu0 %686 }
 0x160   : > { %v1219_v41 = vpop.f32.mrf.mxu1  ;;  %v1396_v30 = vadd.f32 %v1395_v33, %v1307_v4  ;;  %v1514_v40 = vpack.c.bf16 %v1462_v16, %v1460_v13  ;;  %v1512_v46 = vpack.c.bf16 %v1458_v21, %v1456_v32  ;;  %v2825_v16 = vld [vmem:[%s4144_s3 + $0x14] sm:$0xf0] }
 0x161   : > { %v1220_v37 = vadd.f32 %v1219_v41, %v1131_v62  ;;  %v1516_v62 = vpack.c.bf16 %v1466_v7, %v1464_v48  ;;  %v1386_v41 = vadd.f32 %v3691_v0, %v1297_v56 }
 0x162   : > { %v1469_v33 = vmax.f32 %v1396_v30, 0.0 }
 0x163   : > { %v1470_v49 = vmax.f32 %v1220_v37, 0.0 }
 0x165   : > { %v1308_v55 = vpop.f32.mrf.mxu2  ;;  %v1518_v1 = vpack.c.bf16 %v1470_v49, %v1468_v57  ;;  %v1461_v57 = vmax.f32 %v1386_v41, 0.0  ;;  %v1459_v49 = vmax.f32 %v1383_v31, 0.0 }
 0x166   : > { %v1397_v8 = vpop.f32.mrf.mxu3  ;;  %v1309_v10 = vadd.f32 %v1308_v55, %v3423_v9  ;;  %v1133_v44 = vpop.f32.mrf.mxu0  ;;  %v1391_v9 = vadd.f32 %v1390_v28, %v1302_v20 }
 0x167   : > { %1728 = vmatpush.bf16.msrb.mxu0 %v1518_v1  ;;  %v1134_v37 = vadd.f32 %v1133_v44, %v687_v6  ;;  %v1515_v0 = vpack.c.bf16 %v1463_v51, %v1461_v57  ;;  %v1513_v1 = vpack.c.bf16 %v1459_v49, %v1457_v3 }
 0x168   : > { %v1398_v27 = vadd.f32 %v1397_v8, %v1309_v10  ;;  %v1222_v45 = vpop.f32.mrf.mxu1  ;;  %v1465_v2 = vmax.f32 %v1391_v9, 0.0 }
 0x169   : > { %v3738_v35 = vadd.f32 %v1222_v45, %v1134_v37 }
 0x16a   : > { %v1471_v26 = vmax.f32 %v1398_v27, 0.0  ;;  %v1517_v23 = vpack.c.bf16 %v1467_v11, %v1465_v2 }
 0x16b   : > { %4170 = vst [vmem:[#allocation13_spill] sm:$0xff] %v3738_v35  ;;  %1729 = vmatpush.bf16.msrb.mxu0 %v1516_v62 }
 0x16c   : > { %v1519_v8 = vpack.c.bf16 %v1471_v26, %v1469_v33 }
 0x16d   : > { %v1311_v7 = vpop.f32.mrf.mxu2 }
 0x16e   : > { %v1400_v4 = vpop.f32.mrf.mxu3  ;;  %v1312_v60 = vadd.f32 %v1311_v7, %v687_v6  ;;  %1826 = vmatpush.bf16.msrb.mxu2 %v1519_v8  ;;  %v3747_v28 = vpop.f32.mrf.mxu0  ;;  %v2823_v6 = vld [vmem:[%s4144_s3 + $0x4] sm:$0xf0]  ;;  %v2680_v7 = vld [vmem:[%s4144_s3 + $0x20] sm:$0xf] }
 0x16f   : > { %1730 = vmatpush.bf16.msrb.mxu0 %v1514_v40 }
 0x170   : > { %v3750_v12 = vadd.f32 %v1400_v4, %v1312_v60  ;;  %v3752_v47 = vpop.f32.mrf.mxu1  ;;  %v2827_v4 = vld [vmem:[%s4144_s3 + $0x24] sm:$0xf0] }
 0x171   : > { %4172 = vst [vmem:[#allocation15_spill] sm:$0xff] %v3752_v47  ;;  %v2681_v2 = vor.u32 %v2827_v4, %v2680_v7 }
 0x172   : > { %4171 = vst [vmem:[#allocation14_spill] sm:$0xff] %v3750_v12  ;;  %1827 = vmatpush.bf16.msrb.mxu2 %v1517_v23 }
 0x173   : > { %1731 = vmatpush.bf16.msrb.mxu0 %v1512_v46 }
 0x175   : > { %v3754_v19 = vpop.f32.mrf.mxu2 }
 0x176   : > { %4173 = vst [vmem:[#allocation16_spill] sm:$0xff] %v3754_v19  ;;  %v3756_v36 = vpop.f32.mrf.mxu3  ;;  %1828 = vmatpush.bf16.msrb.mxu2 %v1515_v0  ;;  %v1138_v54 = vpop.f32.mrf.mxu0 }
 0x177   : > { %4174 = vst [vmem:[#allocation17_spill] sm:$0xff] %v3756_v36  ;;  %v1139_v48 = vadd.f32 %v1138_v54, %v3497_v42  ;;  %1732 = vmatpush.bf16.msrb.mxu0 %v3649_v52  ;;  %v2664_v52 = vld [vmem:[%s4144_s3] sm:$0xf]  ;;  %v2688_v54 = vld [vmem:[%s4144_s3 + $0x30] sm:$0xf] }
 0x178   : > { %v1227_v55 = vpop.f32.mrf.mxu1 }
 0x179   : > { %v3761_v20 = vadd.f32 %v1227_v55, %v1139_v48  ;;  %v2829_v48 = vld [vmem:[%s4144_s3 + $0x34] sm:$0xf0] }
 0x17a   : > { %1829 = vmatpush.bf16.msrb.mxu2 %v1513_v1 }
 0x17b   : > { %4175 = vst [vmem:[#allocation18_spill] sm:$0xff] %v3761_v20  ;;  %1733 = vmatpush.bf16.msrb.mxu0 %v3611_v15 }
 0x17d   : > { %v1316_v30 = vpop.f32.mrf.mxu2 }
 0x17e   : > { %v1405_v10 = vpop.f32.mrf.mxu3  ;;  %v1317_v44 = vadd.f32 %v1316_v30, %v3497_v42  ;;  %1830 = vmatpush.bf16.msrb.mxu2 %v3655_v29  ;;  %v3766_v25 = vpop.f32.mrf.mxu0  ;;  %v2665_v42 = vor.u32 %v2823_v6, %v2664_v52  ;;  %v2689_v30 = vor.u32 %v2829_v48, %v2688_v54 }
 0x17f   : > { %1734 = vmatpush.bf16.msrb.mxu0 %v3570_v53 }
 0x180   : > { %v3775_v37 = vadd.f32 %v1405_v10, %v1317_v44  ;;  %v3777_v15 = vpop.f32.mrf.mxu1 }
 0x182   : > { %4176 = vst [vmem:[#allocation19_spill] sm:$0xff] %v3775_v37  ;;  %1831 = vmatpush.bf16.msrb.mxu2 %v3624_v38 }
 0x183   : > { %1735 = vmatpush.bf16.msrb.mxu0 %v3579_v24 }
 0x185   : > { %v3781_v29 = vpop.f32.mrf.mxu2 }
 0x186   : > { %v3783_v53 = vpop.f32.mrf.mxu3  ;;  %1832 = vmatpush.bf16.msrb.mxu2 %v3586_v43  ;;  %v1143_v63 = vpop.f32.mrf.mxu0  ;;  %1736 = vmatmul.bf16.vlgmr.msrb.gmra.mxu0 %v2665_v42  ;;  %v2672_v43 = vld [vmem:[%s4144_s3 + $0x10] sm:$0xf] }
 0x187   : > { %4177 = vst [vmem:[#allocation20_spill] sm:$0xff] %v3783_v53  ;;  %v1144_v61 = vadd.f32 %v1143_v63, %v3519_v59  ;;  %v4184_v53 = vld [vmem:[#allocation10_spill] sm:$0xff] }
 0x188   : > { %v1232_v58 = vpop.f32.mrf.mxu1 }
 0x189   : > { %v3787_v27 = vadd.f32 %v1232_v58, %v1144_v61  ;;  %v2696_v61 = vld [vmem:[%s4144_s3 + $0x40] sm:$0xf]  ;;  %v2831_v58 = vld [vmem:[%s4144_s3 + $0x44] sm:$0xf0] }
 0x18a   : > { %1833 = vmatpush.bf16.msrb.mxu2 %v3581_v34  ;;  %v2673_v34 = vor.u32 %v2825_v16, %v2672_v43 }
 0x18d   : > { %v1321_v45 = vpop.f32.mrf.mxu2  ;;  %1834 = vmatmul.bf16.vlgmr.msrb.gmra.mxu2 %v2665_v42 }
 0x18e   : > { %v1410_v38 = vpop.f32.mrf.mxu3  ;;  %v1322_v24 = vadd.f32 %v1321_v45, %v3519_v59  ;;  %v3791_v13 = vpop.f32.mrf.mxu0 }
 0x190   : > { %v3799_v62 = vadd.f32 %v1410_v38, %v1322_v24  ;;  %v3801_v56 = vpop.f32.mrf.mxu1  ;;  %v2697_v38 = vor.u32 %v2831_v58, %v2696_v61  ;;  %v4181_v61 = vld [vmem:[#allocation7_spill] sm:$0xff] }
 0x192   : > { %4178 = vst [vmem:[#allocation21_spill] sm:$0xff] %v3799_v62 }
 0x195   : > { %v3803_v9 = vpop.f32.mrf.mxu2 }
 0x196   : > { %v3805_v33 = vpop.f32.mrf.mxu3  ;;  %v1148_v59 = vpop.f32.mrf.mxu0  ;;  %1741 = vmatmul.bf16.gmra.mxu0 %v2673_v34 }
 0x197   : > { %4179 = vst [vmem:[#allocation22_spill] sm:$0xff] %v3805_v33  ;;  %v1149_v26 = vadd.f32 %v1148_v59, %v3511_v50 }
 0x198   : > { %v1237_v39 = vpop.f32.mrf.mxu1 }
 0x199   : > { %v3808_v22 = vadd.f32 %v1237_v39, %v1149_v26 }
 0x19d   : > { %v1326_v11 = vpop.f32.mrf.mxu2  ;;  %1839 = vmatmul.bf16.gmra.mxu2 %v2673_v34 }
 0x19e   : > { %v1415_v8 = vpop.f32.mrf.mxu3  ;;  %v1327_v32 = vadd.f32 %v1326_v11, %v3511_v50  ;;  %v3811_v21 = vpop.f32.mrf.mxu0  ;;  %v2704_v11 = vld [vmem:[%s4144_s3 + $0x50] sm:$0xf] }
 0x1a0   : > { %v3819_v40 = vadd.f32 %v1415_v8, %v1327_v32  ;;  %v3821_v41 = vpop.f32.mrf.mxu1  ;;  %v2833_v8 = vld [vmem:[%s4144_s3 + $0x54] sm:$0xf0] }
 0x1a1   : > { %v2705_v7 = vor.u32 %v2833_v8, %v2704_v11  ;;  %v2835_v11 = vld [vmem:[%s4144_s3 + $0x64] sm:$0xf0] }
 0x1a2   : > { %4180 = vst [vmem:[#allocation23_spill] sm:$0xff] %v3819_v40 }
 0x1a5   : > { %v3823_v60 = vpop.f32.mrf.mxu2 }
 0x1a6   : > { %v3825_v31 = vpop.f32.mrf.mxu3  ;;  %v1153_v50 = vpop.f32.mrf.mxu0  ;;  %1746 = vmatmul.bf16.gmra.mxu0 %v2681_v2 }
 0x1a7   : > { %v1154_v51 = vadd.f32 %v1153_v50, %v3437_v14 }
 0x1a8   : > { %v1242_v23 = vpop.f32.mrf.mxu1 }
 0x1a9   : > { %v3828_v46 = vadd.f32 %v1242_v23, %v1154_v51 }
 0x1ad   : > { %v1331_v57 = vpop.f32.mrf.mxu2  ;;  %1844 = vmatmul.bf16.gmra.mxu2 %v2681_v2 }
 0x1ae   : > { %v1420_v49 = vpop.f32.mrf.mxu3  ;;  %v1332_v0 = vadd.f32 %v1331_v57, %v3437_v14  ;;  %v1155_v3 = vpop.f32.mrf.mxu0 }
 0x1af   : > { %v1156_v19 = vadd.f32 %v1155_v3, %v4184_v53 }
 0x1b0   : > { %v3837_v55 = vadd.f32 %v1420_v49, %v1332_v0  ;;  %v3839_v1 = vpop.f32.mrf.mxu1 }
 0x1b5   : > { %v3841_v10 = vpop.f32.mrf.mxu2 }
 0x1b6   : > { %v3843_v44 = vpop.f32.mrf.mxu3  ;;  %v1158_v52 = vpop.f32.mrf.mxu0  ;;  %1751 = vmatmul.bf16.gmra.mxu0 %v2689_v30 }
 0x1b8   : > { %v1247_v14 = vpop.f32.mrf.mxu1 }
 0x1bd   : > { %v3845_v6 = vpop.f32.mrf.mxu2  ;;  %1849 = vmatmul.bf16.gmra.mxu2 %v2689_v30 }
 0x1be   : > { %v3847_v42 = vpop.f32.mrf.mxu3  ;;  %v1160_v63 = vpop.f32.mrf.mxu0 }
 0x1c0   : > { %v1249_v45 = vpop.f32.mrf.mxu1 }
 0x1c5   : > { %v1338_v24 = vpop.f32.mrf.mxu2 }
 0x1c6   : > { %v3855_v43 = vpop.f32.mrf.mxu3  ;;  %v1163_v16 = vpop.f32.mrf.mxu0  ;;  %1756 = vmatmul.bf16.gmra.mxu0 %v2697_v38 }
 0x1c7   : > { %v1164_v48 = vadd.f32 %v1163_v16, %v3441_v18  ;;  %v4183_v16 = vld [vmem:[#allocation8_spill] sm:$0xff] }
 0x1c8   : > { %v1252_v34 = vpop.f32.mrf.mxu1 }
 0x1cd   : > { %v1341_v59 = vpop.f32.mrf.mxu2  ;;  %1854 = vmatmul.bf16.gmra.mxu2 %v2697_v38  ;;  %v2712_v38 = vld [vmem:[%s4144_s3 + $0x60] sm:$0xf] }
 0x1ce   : > { %v1430_v26 = vpop.f32.mrf.mxu3  ;;  %v1165_v39 = vpop.f32.mrf.mxu0  ;;  %v2713_v36 = vor.u32 %v2835_v11, %v2712_v38 }
 0x1cf   : > { %v1166_v57 = vadd.f32 %v1165_v39, %v3439_v17  ;;  %v692_v38 = vpop.permute.xlu1 %691 }
 0x1d0   : > { %v1254_v32 = vpop.f32.mrf.mxu1 }
 0x1d1   : > { %v1255_v12 = vadd.f32 %v1254_v32, %v1166_v57 }
 0x1d3   : > { %v1498_v20 = vmax.f32 %v1255_v12, 0.0  ;;  %v1245_v12 = vadd.f32 %v3839_v1, %v1156_v19 }
 0x1d5   : > { %v1343_v4 = vpop.f32.mrf.mxu2  ;;  %v1490_v1 = vmax.f32 %v1245_v12, 0.0 }
 0x1d6   : > { %v1432_v2 = vpop.f32.mrf.mxu3  ;;  %v1168_v50 = vpop.f32.mrf.mxu0  ;;  %1761 = vmatmul.bf16.gmra.mxu0 %v2705_v7  ;;  %v1344_v35 = vadd.f32 %v1343_v4, %v3439_v17  ;;  %v4185_v4 = vld [vmem:[#allocation11_spill] sm:$0xff] }
 0x1d7   : > { %v1169_v23 = vadd.f32 %v1168_v50, %v3415_v5  ;;  %v4182_v50 = vld [vmem:[#allocation6_spill] sm:$0xff]  ;;  %v1151_v3 = vadd.f32 %v3811_v21, %v4185_v4 }
 0x1d8   : > { %v1257_v51 = vpop.f32.mrf.mxu1  ;;  %v1161_v39 = vadd.f32 %v1160_v63, %v4182_v50  ;;  %v1342_v63 = vadd.f32 %v1341_v59, %v3441_v18  ;;  %v1337_v18 = vadd.f32 %v3845_v6, %v4183_v16 }
 0x1d9   : > { %v1258_v30 = vadd.f32 %v1257_v51, %v1169_v23  ;;  %v1159_v51 = vadd.f32 %v1158_v52, %v4183_v16  ;;  %v1253_v23 = vadd.f32 %v1252_v34, %v1164_v48  ;;  %v1433_v34 = vadd.f32 %v1432_v2, %v1344_v35 }
 0x1da   : > { %v1250_v40 = vadd.f32 %v1249_v45, %v1161_v39  ;;  %v1334_v35 = vadd.f32 %v3841_v10, %v4184_v53  ;;  %v2720_v53 = vld [vmem:[%s4144_s3 + $0x70] sm:$0xf] }
 0x1dd   : > { %v1346_v49 = vpop.f32.mrf.mxu2  ;;  %1859 = vmatmul.bf16.gmra.mxu2 %v2705_v7 }
 0x1de   : > { %v1435_v0 = vpop.f32.mrf.mxu3  ;;  %v1170_v54 = vpop.f32.mrf.mxu0  ;;  %v1347_v7 = vadd.f32 %v1346_v49, %v3415_v5  ;;  %v1248_v5 = vadd.f32 %v1247_v14, %v1159_v51  ;;  %v1496_v49 = vmax.f32 %v1253_v23, 0.0  ;;  %v1489_v23 = vmax.f32 %v3837_v55, 0.0  ;;  %v4192_v55 = vld [vmem:[#allocation16_spill] sm:$0xff] }
 0x1df   : > { %v1171_v58 = vadd.f32 %v1170_v54, %v4181_v61  ;;  %v1500_v54 = vmax.f32 %v1258_v30, 0.0 }
 0x1e0   : > { %v1259_v8 = vpop.f32.mrf.mxu1  ;;  %v1436_v32 = vadd.f32 %v1435_v0, %v1347_v7  ;;  %v1532_v45 = vpack.c.bf16 %v1498_v20, %v1496_v49  ;;  %v4186_v0 = vld [vmem:[#allocation9_spill] sm:$0xff]  ;;  %v1492_v48 = vmax.f32 %v1248_v5, 0.0  ;;  %v1240_v20 = vadd.f32 %v3821_v41, %v1151_v3  ;;  %v4190_v5 = vld [vmem:[#allocation18_spill] sm:$0xff] }
 0x1e1   : > { %v1260_v37 = vadd.f32 %v1259_v8, %v1171_v58  ;;  %v2837_v41 = vld [vmem:[%s4144_s3 + $0x74] sm:$0xf0] }
 0x1e2   : > { %v1501_v59 = vmax.f32 %v1436_v32, 0.0  ;;  %v2721_v8 = vor.u32 %v2837_v41, %v2720_v53  ;;  %v4189_v32 = vld [vmem:[#allocation15_spill] sm:$0xff]  ;;  %v2674_v53 = vld [vmem:[%s4144_s3 + $0x18] sm:$0xf0] }
 0x1e3   : > { %v1502_v62 = vmax.f32 %v1260_v37, 0.0  ;;  %v1339_v37 = vadd.f32 %v1338_v24, %v4182_v50  ;;  %v1499_v24 = vmax.f32 %v1433_v34, 0.0  ;;  %v1136_v50 = vadd.f32 %v3747_v28, %v692_v38 }
 0x1e4   : > { %v1314_v34 = vadd.f32 %v4192_v55, %v692_v38 }
 0x1e5   : > { %v1348_v47 = vpop.f32.mrf.mxu2  ;;  %v1534_v33 = vpack.c.bf16 %v1502_v62, %v1500_v54  ;;  %v1494_v62 = vmax.f32 %v1250_v40, 0.0  ;;  %v1428_v21 = vadd.f32 %v3855_v43, %v1339_v37  ;;  %v1488_v40 = vmax.f32 %v3828_v46, 0.0  ;;  %v4188_v54 = vld [vmem:[#allocation22_spill] sm:$0xff] }
 0x1e6   : > { %v1349_v57 = vadd.f32 %v1348_v47, %v4181_v61  ;;  %1766 = vmatmul.bf16.gmra.mxu0 %v2713_v36  ;;  %v1437_v52 = vpop.f32.mrf.mxu3  ;;  %v1431_v47 = vadd.f32 %v1430_v26, %v1342_v63  ;;  %v1426_v26 = vadd.f32 %v3847_v42, %v1337_v18  ;;  %v1423_v46 = vadd.f32 %v3843_v44, %v1334_v35 }
 0x1e7   : > { %1777 = vmatpush.bf16.msrb.mxu1 %v1534_v33  ;;  %v1146_v33 = vadd.f32 %v3791_v13, %v4186_v0  ;;  %v1530_v6 = vpack.c.bf16 %v1494_v62, %v1492_v48  ;;  %v4187_v13 = vld [vmem:[#allocation12_spill] sm:$0xff]  ;;  %v1495_v10 = vmax.f32 %v1428_v21, 0.0  ;;  %v1486_v61 = vmax.f32 %v1240_v20, 0.0  ;;  %v4194_v62 = vld [vmem:[#allocation13_spill] sm:$0xff] }
 0x1e8   : > { %v1438_v17 = vadd.f32 %v1437_v52, %v1349_v57  ;;  %v1497_v2 = vmax.f32 %v1431_v47, 0.0  ;;  %v1141_v30 = vadd.f32 %v3766_v25, %v4187_v13  ;;  %v1484_v25 = vmax.f32 %v3808_v22, 0.0  ;;  %v4191_v52 = vld [vmem:[#allocation23_spill] sm:$0xff]  ;;  %v4195_v47 = vld [vmem:[#allocation21_spill] sm:$0xff] }
 0x1e9   : > { %v1235_v43 = vadd.f32 %v3801_v56, %v1146_v33  ;;  %v1528_v58 = vpack.c.bf16 %v1490_v1, %v1488_v40  ;;  %v1493_v11 = vmax.f32 %v1426_v26, 0.0  ;;  %v1491_v39 = vmax.f32 %v1423_v46, 0.0  ;;  %v4196_v33 = vld [vmem:[#allocation17_spill] sm:$0xff]  ;;  %v4198_v26 = vld [vmem:[#allocation14_spill] sm:$0xff]  ;;  %v2682_v46 = vld [vmem:[%s4144_s3 + $0x28] sm:$0xf0] }
 0x1ea   : > { %v1503_v14 = vmax.f32 %v1438_v17, 0.0  ;;  %v1533_v42 = vpack.c.bf16 %v1499_v24, %v1497_v2  ;;  %v1230_v56 = vadd.f32 %v3777_v15, %v1141_v30  ;;  %v1480_v22 = vmax.f32 %v3787_v27, 0.0  ;;  %v4193_v17 = vld [vmem:[#allocation20_spill] sm:$0xff] }
 0x1eb   : > { %1778 = vmatpush.bf16.msrb.mxu1 %v1532_v45  ;;  %v1531_v7 = vpack.c.bf16 %v1495_v10, %v1493_v11  ;;  %v1482_v16 = vmax.f32 %v1235_v43, 0.0  ;;  %v1526_v51 = vpack.c.bf16 %v1486_v61, %v1484_v25  ;;  %v1319_v28 = vadd.f32 %v3781_v29, %v4187_v13  ;;  %v2824_v30 = vld [vmem:[%s4144_s3 + $0x14] sm:$0xf]  ;;  %v2690_v43 = vld [vmem:[%s4144_s3 + $0x38] sm:$0xf0] }
 0x1ec   : > { %v1535_v19 = vpack.c.bf16 %v1503_v14, %v1501_v59  ;;  %v1225_v57 = vadd.f32 %v4189_v32, %v1136_v50  ;;  %v1476_v15 = vmax.f32 %v4190_v5, 0.0  ;;  %v1478_v49 = vmax.f32 %v1230_v56, 0.0  ;;  %v2822_v14 = vld [vmem:[%s4144_s3 + $0x4] sm:$0xf]  ;;  %v2832_v11 = vld [vmem:[%s4144_s3 + $0x54] sm:$0xf]  ;;  %v3987_v32 = vpop.permute.xlu0 %1645 }
 0x1ed   : > { %1864 = vmatmul.bf16.gmra.mxu2 %v2713_v36  ;;  %v1329_v36 = vadd.f32 %v3823_v60, %v4185_v4  ;;  %v1324_v60 = vadd.f32 %v3803_v9, %v4186_v0  ;;  %v1524_v27 = vpack.c.bf16 %v1482_v16, %v1480_v22  ;;  %v1485_v37 = vmax.f32 %v4191_v52, 0.0  ;;  %v2666_v0 = vld [vmem:[%s4144_s3 + $0x8] sm:$0xf0]  ;;  %v2830_v61 = vld [vmem:[%s4144_s3 + $0x44] sm:$0xf] }
 0x1ee   : > { %1875 = vmatpush.bf16.msrb.mxu3 %v1535_v19  ;;  %v1408_v4 = vadd.f32 %v4193_v17, %v1319_v28  ;;  %v1522_v12 = vpack.c.bf16 %v1478_v49, %v1476_v15  ;;  %v1472_v45 = vmax.f32 %v4194_v62, 0.0  ;;  %v1474_v18 = vmax.f32 %v1225_v57, 0.0  ;;  %v4197_v19 = vld [vmem:[#allocation19_spill] sm:$0xff] }
 0x1ef   : > { %1779 = vmatpush.bf16.msrb.mxu1 %v1530_v6  ;;  %v1418_v44 = vadd.f32 %v3825_v31, %v1329_v36  ;;  %v1413_v9 = vadd.f32 %v4188_v54, %v1324_v60  ;;  %v1529_v31 = vpack.c.bf16 %v1491_v39, %v1489_v23  ;;  %v1481_v59 = vmax.f32 %v4195_v47, 0.0  ;;  %v2826_v36 = vld [vmem:[%s4144_s3 + $0x24] sm:$0xf]  ;;  %v3963_v60 = vpop.permute.xlu2 %1640 }
 0x1f0   : > { %v1403_v48 = vadd.f32 %v4196_v33, %v1314_v34  ;;  %v1479_v35 = vmax.f32 %v1408_v4, 0.0  ;;  %v1520_v24 = vpack.c.bf16 %v1474_v18, %v1472_v45  ;;  %v1477_v20 = vmax.f32 %v4197_v19, 0.0  ;;  %v2834_v39 = vld [vmem:[%s4144_s3 + $0x64] sm:$0xf] }
 0x1f1   : > { %v1487_v63 = vmax.f32 %v1418_v44, 0.0  ;;  %v1483_v3 = vmax.f32 %v1413_v9, 0.0  ;;  %v2669_v40 = vor.u32 %v2822_v14, %v2666_v0  ;;  %v1473_v2 = vmax.f32 %v4198_v26, 0.0  ;;  %v3965_v44 = vpop.permute.xlu1 %1630 }
 0x1f2   : > { %1876 = vmatpush.bf16.msrb.mxu3 %v1533_v42  ;;  %v1475_v1 = vmax.f32 %v1403_v48, 0.0  ;;  %v1523_v6 = vpack.c.bf16 %v1479_v35, %v1477_v20  ;;  %v2677_v41 = vor.u32 %v2824_v30, %v2674_v53  ;;  %v2685_v10 = vor.u32 %v2826_v36, %v2682_v46  ;;  %v2828_v42 = vld [vmem:[%s4144_s3 + $0x34] sm:$0xf] }
 0x1f3   : > { %1780 = vmatpush.bf16.msrb.mxu1 %v1528_v58  ;;  %v1527_v29 = vpack.c.bf16 %v1487_v63, %v1485_v37  ;;  %v1525_v21 = vpack.c.bf16 %v1483_v3, %v1481_v59  ;;  %v2693_v25 = vor.u32 %v2828_v42, %v2690_v43  ;;  %v2698_v58 = vld [vmem:[%s4144_s3 + $0x48] sm:$0xf0]  ;;  %v2836_v63 = vld [vmem:[%s4144_s3 + $0x74] sm:$0xf] }
 0x1f4   : > { %v1521_v13 = vpack.c.bf16 %v1475_v1, %v1473_v2  ;;  %v2701_v38 = vor.u32 %v2830_v61, %v2698_v58  ;;  %v3993_v52 = vpop.permute.xlu0 %1620 }
 0x1f6   : > { %1877 = vmatpush.bf16.msrb.mxu3 %v1531_v7  ;;  %1771 = vmatmul.bf16.gmra.mxu0 %v2721_v8  ;;  %v2714_v7 = vld [vmem:[%s4144_s3 + $0x68] sm:$0xf0] }
 0x1f7   : > { %1781 = vmatpush.bf16.msrb.mxu1 %v1526_v51  ;;  %v3973_v56 = vpop.permute.xlu2 %1635  ;;  %v2717_v16 = vor.u32 %v2834_v39, %v2714_v7 }
 0x1f9   : > { %v3975_v51 = vpop.permute.xlu1 %1625 }
 0x1fa   : > { %1878 = vmatpush.bf16.msrb.mxu3 %v1529_v31  ;;  %v2722_v31 = vld [vmem:[%s4144_s3 + $0x78] sm:$0xf0] }
 0x1fb   : > { %1782 = vmatpush.bf16.msrb.mxu1 %v1524_v27  ;;  %v2725_v57 = vor.u32 %v2836_v63, %v2722_v31 }
 0x1fd   : > { %1869 = vmatmul.bf16.gmra.mxu2 %v2721_v8  ;;  %v2706_v8 = vld [vmem:[%s4144_s3 + $0x58] sm:$0xf0] }
 0x1fe   : > { %1879 = vmatpush.bf16.msrb.mxu3 %v1527_v29  ;;  %v2709_v50 = vor.u32 %v2832_v11, %v2706_v8 }
 0x1ff   : > { %1783 = vmatpush.bf16.msrb.mxu1 %v1522_v12  ;;  %v3977_v23 = vpop.permute.xlu2 %1610  ;;  %v3995_v12 = vpop.permute.xlu0 %1615 }
 0x201   : > { %v3979_v54 = vpop.permute.xlu1 %1600 }
 0x202   : > { %1880 = vmatpush.bf16.msrb.mxu3 %v1525_v21 }
 0x203   : > { %1784 = vmatpush.bf16.msrb.mxu1 %v1520_v24  ;;  %v1737_v22 = vpop.f32.mrf.mxu0 }
 0x206   : > { %1881 = vmatpush.bf16.msrb.mxu3 %v1523_v6  ;;  %1785 = vmatmul.bf16.vlgmr.msrb.gmra.mxu1 %v2669_v40 }
 0x207   : > { %v3989_v5 = vpop.permute.xlu2 %1605  ;;  %v1591_v48 = vpop.permute.xlu0 %1590 }
 0x209   : > { %v3991_v49 = vpop.permute.xlu1 %1595 }
 0x20a   : > { %1882 = vmatpush.bf16.msrb.mxu3 %v1521_v13 }
 0x20b   : > { %v1739_v28 = vpop.f32.mrf.mxu0 }
 0x20d   : > { %1883 = vmatmul.bf16.vlgmr.msrb.gmra.mxu3 %v2669_v40 }
 0x20f   : > { %v1581_v37 = vpop.permute.xlu2 %1580  ;;  %v1586_v30 = vpop.permute.xlu0 %1585 }
 0x210   : > { %v1835_v9 = vpop.f32.mrf.mxu2 }
 0x211   : > { %v1571_v34 = vpop.permute.xlu1 %1570 }
 0x212   : > { %v1738_v17 = vadd.f32 %v1737_v22, %v1571_v34  ;;  %v1836_v35 = vadd.f32 %v1835_v9, %v1571_v34 }
 0x213   : > { %v1742_v15 = vpop.f32.mrf.mxu0 }
 0x214   : > { %v1743_v20 = vadd.f32 %v1742_v15, %v1581_v37 }
 0x216   : > { %1790 = vmatmul.bf16.gmra.mxu1 %v2677_v41 }
 0x217   : > { %v1576_v62 = vpop.permute.xlu2 %1575 }
 0x218   : > { %v1837_v27 = vpop.f32.mrf.mxu2  ;;  %v1740_v18 = vadd.f32 %v1739_v28, %v1576_v62 }
 0x219   : > { %v1838_v2 = vadd.f32 %v1837_v27, %v1576_v62 }
 0x21b   : > { %v1744_v55 = vpop.f32.mrf.mxu0 }
 0x21d   : > { %1888 = vmatmul.bf16.gmra.mxu3 %v2677_v41  ;;  %v1745_v41 = vadd.f32 %v1744_v55, %v1586_v30 }
 0x220   : > { %v1840_v4 = vpop.f32.mrf.mxu2 }
 0x223   : > { %v1747_v45 = vpop.f32.mrf.mxu0 }
 0x224   : > { %v1748_v7 = vadd.f32 %v1747_v45, %v1591_v48 }
 0x226   : > { %1795 = vmatmul.bf16.gmra.mxu1 %v2685_v10 }
 0x228   : > { %v1842_v59 = vpop.f32.mrf.mxu2 }
 0x229   : > { %v1843_v28 = vadd.f32 %v1842_v59, %v1586_v30 }
 0x22b   : > { %v1749_v40 = vpop.f32.mrf.mxu0 }
 0x22d   : > { %1893 = vmatmul.bf16.gmra.mxu3 %v2685_v10 }
 0x230   : > { %v1845_v26 = vpop.f32.mrf.mxu2 }
 0x233   : > { %v1752_v43 = vpop.f32.mrf.mxu0 }
 0x234   : > { %v1753_v59 = vadd.f32 %v1752_v43, %v3979_v54 }
 0x236   : > { %1800 = vmatmul.bf16.gmra.mxu1 %v2693_v25 }
 0x238   : > { %v1847_v11 = vpop.f32.mrf.mxu2 }
 0x23b   : > { %v1754_v9 = vpop.f32.mrf.mxu0 }
 0x23d   : > { %1898 = vmatmul.bf16.gmra.mxu3 %v2693_v25 }
 0x240   : > { %v1850_v15 = vpop.f32.mrf.mxu2 }
 0x246   : > { %1805 = vmatmul.bf16.gmra.mxu1 %v2701_v38 }
 0x24d   : > { %1903 = vmatmul.bf16.gmra.mxu3 %v2701_v38  ;;  %v1841_v38 = vadd.f32 %v1840_v4, %v1581_v37 }
 0x256   : > { %1810 = vmatmul.bf16.gmra.mxu1 %v2709_v50 }
 0x25d   : > { %1908 = vmatmul.bf16.gmra.mxu3 %v2709_v50 }
 0x266   : > { %1815 = vmatmul.bf16.gmra.mxu1 %v2717_v16 }
 0x26d   : > { %1913 = vmatmul.bf16.gmra.mxu3 %v2717_v16 }
 0x276   : > { %1820 = vmatmul.bf16.gmra.mxu1 %v2725_v57 }
 0x27d   : > { %1918 = vmatmul.bf16.gmra.mxu3 %v2725_v57  ;;  %v1750_v57 = vadd.f32 %v1749_v40, %v3991_v49 }
 0x283   : > { %v1786_v3 = vpop.f32.mrf.mxu1 }
 0x284   : > { %v1787_v29 = vadd.f32 %v1786_v3, %v1738_v17 }
 0x286   : > { %v1924_v0 = vmax.f32 %v1787_v29, 0.0  ;;  %v1846_v29 = vadd.f32 %v1845_v26, %v1591_v48 }
 0x28b   : > { %v1788_v47 = vpop.f32.mrf.mxu1 }
 0x28c   : > { %v1789_v14 = vadd.f32 %v1788_v47, %v1740_v18  ;;  %v1757_v18 = vpop.f32.mrf.mxu0 }
 0x28e   : > { %v1926_v33 = vmax.f32 %v1789_v14, 0.0 }
 0x290   : > { %v3997_v21 = vpack.c.bf16 %v1926_v33, %v1924_v0  ;;  %v1884_v24 = vpop.f32.mrf.mxu3  ;;  %v1852_v0 = vpop.f32.mrf.mxu2 }
 0x291   : > { %v1885_v19 = vadd.f32 %v1884_v24, %v1836_v35  ;;  %v1848_v35 = vadd.f32 %v1847_v11, %v3991_v49 }
 0x293   : > { %v1791_v1 = vpop.f32.mrf.mxu1  ;;  %v1925_v36 = vmax.f32 %v1885_v19, 0.0 }
 0x294   : > { %v1792_v6 = vadd.f32 %v1791_v1, %v1743_v20  ;;  %v1755_v20 = vadd.f32 %v1754_v9, %v3989_v5  ;;  %v4011_v40 = vpop.f32.mrf.mxu0 }
 0x296   : > { %v1928_v61 = vmax.f32 %v1792_v6, 0.0 }
 0x298   : > { %v1886_v13 = vpop.f32.mrf.mxu3 }
 0x299   : > { %v1887_v53 = vadd.f32 %v1886_v13, %v1838_v2  ;;  %v1855_v13 = vpop.f32.mrf.mxu2 }
 0x29b   : > { %v1927_v46 = vmax.f32 %v1887_v53, 0.0  ;;  %v1793_v10 = vpop.f32.mrf.mxu1 }
 0x29c   : > { %v1794_v42 = vadd.f32 %v1793_v10, %v1745_v41  ;;  %v1851_v41 = vadd.f32 %v1850_v15, %v3979_v54  ;;  %v1758_v10 = vadd.f32 %v1757_v18, %v3977_v23 }
 0x29d   : > { %v3999_v25 = vpack.c.bf16 %v1927_v46, %v1925_v36 }
 0x29e   : > { %v1930_v58 = vmax.f32 %v1794_v42, 0.0 }
 0x2a0   : > { %v4001_v8 = vpack.c.bf16 %v1930_v58, %v1928_v61  ;;  %v1889_v50 = vpop.f32.mrf.mxu3  ;;  %v1762_v61 = vpop.f32.mrf.mxu0  ;;  %v1853_v58 = vadd.f32 %v1852_v0, %v3989_v5 }
 0x2a1   : > { %v1890_v39 = vadd.f32 %v1889_v50, %v1841_v38  ;;  %v4022_v38 = vpop.f32.mrf.mxu2 }
 0x2a3   : > { %v1796_v22 = vpop.f32.mrf.mxu1  ;;  %v1929_v27 = vmax.f32 %v1890_v39, 0.0 }
 0x2a4   : > { %v1797_v16 = vadd.f32 %v1796_v22, %v1748_v7 }
 0x2a6   : > { %v1932_v4 = vmax.f32 %v1797_v16, 0.0  ;;  %v1856_v16 = vadd.f32 %v1855_v13, %v3977_v23 }
 0x2a8   : > { %v1891_v63 = vpop.f32.mrf.mxu3 }
 0x2a9   : > { %v1892_v31 = vadd.f32 %v1891_v63, %v1843_v28  ;;  %v1764_v28 = vpop.f32.mrf.mxu0 }
 0x2aa   : > { %v1765_v13 = vadd.f32 %v1764_v28, %v3975_v51 }
 0x2ab   : > { %v1931_v55 = vmax.f32 %v1892_v31, 0.0  ;;  %v1798_v34 = vpop.f32.mrf.mxu1  ;;  %v4029_v31 = vpop.f32.mrf.mxu2 }
 0x2ac   : > { %v1799_v17 = vadd.f32 %v1798_v34, %v1750_v57 }
 0x2ad   : > { %v4004_v37 = vpack.c.bf16 %v1931_v55, %v1929_v27 }
 0x2ae   : > { %v1934_v3 = vmax.f32 %v1799_v17, 0.0 }
 0x2b0   : > { %v4006_v62 = vpack.c.bf16 %v1934_v3, %v1932_v4  ;;  %v1894_v45 = vpop.f32.mrf.mxu3 }
 0x2b1   : > { %v1895_v47 = vadd.f32 %v1894_v45, %v1846_v29  ;;  %v1767_v5 = vpop.f32.mrf.mxu0 }
 0x2b3   : > { %v1801_v14 = vpop.f32.mrf.mxu1  ;;  %v1933_v1 = vmax.f32 %v1895_v47, 0.0  ;;  %v1862_v55 = vpop.f32.mrf.mxu2 }
 0x2b4   : > { %v1802_v33 = vadd.f32 %v1801_v14, %v1753_v59 }
 0x2b6   : > { %v1936_v30 = vmax.f32 %v1802_v33, 0.0 }
 0x2b8   : > { %v1896_v24 = vpop.f32.mrf.mxu3 }
 0x2b9   : > { %v1897_v19 = vadd.f32 %v1896_v24, %v1848_v35  ;;  %v1769_v17 = vpop.f32.mrf.mxu0 }
 0x2ba   : > { %v1770_v35 = vadd.f32 %v1769_v17, %v3973_v56 }
 0x2bb   : > { %v1935_v48 = vmax.f32 %v1897_v19, 0.0  ;;  %v1803_v6 = vpop.f32.mrf.mxu1  ;;  %v1865_v3 = vpop.f32.mrf.mxu2 }
 0x2bc   : > { %v1804_v26 = vadd.f32 %v1803_v6, %v1755_v20 }
 0x2bd   : > { %v4013_v2 = vpack.c.bf16 %v1935_v48, %v1933_v1  ;;  %v1768_v48 = vadd.f32 %v1767_v5, %v3965_v44 }
 0x2be   : > { %v1938_v53 = vmax.f32 %v1804_v26, 0.0 }
 0x2c0   : > { %v4016_v36 = vpack.c.bf16 %v1938_v53, %v1936_v30  ;;  %v1899_v49 = vpop.f32.mrf.mxu3 }
 0x2c1   : > { %v1900_v46 = vadd.f32 %v1899_v49, %v1851_v41  ;;  %v1772_v23 = vpop.f32.mrf.mxu0  ;;  %v1763_v49 = vadd.f32 %v1762_v61, %v3993_v52 }
 0x2c2   : > { %v1773_v0 = vadd.f32 %v1772_v23, %v3963_v60  ;;  %v1866_v23 = vadd.f32 %v1865_v3, %v3965_v44  ;;  %v1858_v44 = vadd.f32 %v4022_v38, %v3995_v12 }
 0x2c3   : > { %v1806_v42 = vpop.f32.mrf.mxu1  ;;  %v1937_v39 = vmax.f32 %v1900_v46, 0.0  ;;  %v1867_v18 = vpop.f32.mrf.mxu2 }
 0x2c4   : > { %v4019_v43 = vadd.f32 %v1806_v42, %v1758_v10  ;;  %v1868_v61 = vadd.f32 %v1867_v18, %v3973_v56 }
 0x2c8   : > { %v1901_v11 = vpop.f32.mrf.mxu3 }
 0x2c9   : > { %v1902_v50 = vadd.f32 %v1901_v11, %v1853_v58  ;;  %v1774_v14 = vpop.f32.mrf.mxu0  ;;  %v1760_v11 = vadd.f32 %v4011_v40, %v3995_v12 }
 0x2ca   : > { %v1775_v24 = vadd.f32 %v1774_v14, %v3987_v32 }
 0x2cb   : > { %v1939_v7 = vmax.f32 %v1902_v50, 0.0  ;;  %v1808_v22 = vpop.f32.mrf.mxu1  ;;  %v1870_v19 = vpop.f32.mrf.mxu2 }
 0x2cc   : > { %v1871_v5 = vadd.f32 %v1870_v19, %v3963_v60  ;;  %v1863_v60 = vadd.f32 %v1862_v55, %v3975_v51 }
 0x2cd   : > { %v4024_v54 = vpack.c.bf16 %v1939_v7, %v1937_v39 }
 0x2d0   : > { %v1904_v9 = vpop.f32.mrf.mxu3 }
 0x2d1   : > { %v4027_v63 = vadd.f32 %v1904_v9, %v1856_v16  ;;  %v1809_v16 = vadd.f32 %v1808_v22, %v1760_v11  ;;  %v1940_v22 = vmax.f32 %v4019_v43, 0.0 }
 0x2d3   : > { %v1811_v57 = vpop.f32.mrf.mxu1  ;;  %v1872_v7 = vpop.f32.mrf.mxu2  ;;  %v1941_v12 = vmax.f32 %v4027_v63, 0.0 }
 0x2d4   : > { %v1812_v50 = vadd.f32 %v1811_v57, %v1763_v49 }
 0x2d6   : > { %v1944_v17 = vmax.f32 %v1812_v50, 0.0 }
 0x2d8   : > { %v4031_v15 = vpop.f32.mrf.mxu3 }
 0x2d9   : > { %v1907_v51 = vadd.f32 %v4031_v15, %v1858_v44  ;;  %v2841_v15 = vld [vmem:[%s4146_s5 + $0x18] sm:$0xff] }
 0x2db   : > { %v1813_v27 = vpop.f32.mrf.mxu1 }
 0x2dc   : > { %v1814_v46 = vadd.f32 %v1813_v27, %v1765_v13  ;;  %v1873_v27 = vadd.f32 %v1872_v7, %v3987_v32  ;;  %v1861_v32 = vadd.f32 %v4029_v31, %v3993_v52  ;;  %v1943_v31 = vmax.f32 %v1907_v51, 0.0 }
 0x2de   : > { %v1946_v9 = vmax.f32 %v1814_v46, 0.0  ;;  %v1965_v38 = vpack.c.bf16 %v1943_v31, %v1941_v12 }
 0x2e0   : > { %v4033_v34 = vpop.f32.mrf.mxu3  ;;  %v1966_v40 = vpack.c.bf16 %v1946_v9, %v1944_v17 }
 0x2e1   : > { %v1910_v43 = vadd.f32 %v4033_v34, %v1861_v32  ;;  %v2026_v34 = vpop.permute.xlu1 %2025 }
 0x2e3   : > { %v1816_v4 = vpop.f32.mrf.mxu1  ;;  %v1945_v52 = vmax.f32 %v1910_v43, 0.0 }
 0x2e4   : > { %v1817_v30 = vadd.f32 %v1816_v4, %v1768_v48 }
 0x2e6   : > { %v1948_v39 = vmax.f32 %v1817_v30, 0.0 }
 0x2e8   : > { %v1911_v29 = vpop.f32.mrf.mxu3 }
 0x2e9   : > { %v1912_v18 = vadd.f32 %v1911_v29, %v1863_v60 }
 0x2eb   : > { %v1818_v45 = vpop.f32.mrf.mxu1  ;;  %v1947_v55 = vmax.f32 %v1912_v18, 0.0 }
 0x2ec   : > { %v1819_v6 = vadd.f32 %v1818_v45, %v1770_v35  ;;  %v1942_v45 = vmax.f32 %v1809_v16, 0.0  ;;  %v2001_v16 = vpop.permute.xlu1 %2000 }
 0x2ed   : > { %v1967_v29 = vpack.c.bf16 %v1947_v55, %v1945_v52 }
 0x2ee   : > { %v1950_v10 = vmax.f32 %v1819_v6, 0.0  ;;  %v1964_v56 = vpack.c.bf16 %v1942_v45, %v1940_v22 }
 0x2f0   : > { %v1914_v47 = vpop.f32.mrf.mxu3  ;;  %v1968_v28 = vpack.c.bf16 %v1950_v10, %v1948_v39 }
 0x2f3   : > { %v1821_v59 = vpop.f32.mrf.mxu1 }
 0x2f4   : > { %v1822_v20 = vadd.f32 %v1821_v59, %v1773_v0  ;;  %v1915_v0 = vadd.f32 %v1914_v47, %v1866_v23  ;;  %v1996_v23 = vpop.permute.xlu1 %1995 }
 0x2f6   : > { %v1952_v53 = vmax.f32 %v1822_v20, 0.0  ;;  %v1949_v3 = vmax.f32 %v1915_v0, 0.0 }
 0x2f8   : > { %v1916_v33 = vpop.f32.mrf.mxu3 }
 0x2f9   : > { %v1917_v59 = vadd.f32 %v1916_v33, %v1868_v61 }
 0x2fb   : > { %v1823_v1 = vpop.f32.mrf.mxu1  ;;  %v1951_v19 = vmax.f32 %v1917_v59, 0.0 }
 0x2fc   : > { %v1824_v26 = vadd.f32 %v1823_v1, %v1775_v24 }
 0x2fd   : > { %v1969_v47 = vpack.c.bf16 %v1951_v19, %v1949_v3  ;;  %v2744_v19 = vld [vmem:[%s4148_s7] sm:$0xf] }
 0x2fe   : > { %v1954_v41 = vmax.f32 %v1824_v26, 0.0 }
 0x300   : > { %v1970_v42 = vpack.c.bf16 %v1954_v41, %v1952_v53  ;;  %v1919_v58 = vpop.f32.mrf.mxu3 }
 0x301   : > { %v1920_v4 = vadd.f32 %v1919_v58, %v1871_v5  ;;  %v2011_v58 = vpop.permute.xlu2 %2010 }
 0x302   : > { %2052 = vmatpush.bf16.msra.mxu0 %v1970_v42  ;;  %2843 = vmatpush.bf16.msra.mxu2 %v1970_v42 }
 0x303   : > { %v1953_v35 = vmax.f32 %v1920_v4, 0.0 }
 0x306   : > { %2053 = vmatpush.bf16.msra.mxu0 %v1968_v28  ;;  %2844 = vmatpush.bf16.msra.mxu2 %v1968_v28 }
 0x308   : > { %v1921_v57 = vpop.f32.mrf.mxu3 }
 0x309   : > { %v1922_v14 = vadd.f32 %v1921_v57, %v1873_v27  ;;  %v2006_v17 = vpop.permute.xlu2 %2005 }
 0x30a   : > { %2054 = vmatpush.bf16.msra.mxu0 %v1966_v40  ;;  %2845 = vmatpush.bf16.msra.mxu2 %v1966_v40 }
 0x30b   : > { %v1955_v24 = vmax.f32 %v1922_v14, 0.0 }
 0x30d   : > { %v1971_v20 = vpack.c.bf16 %v1955_v24, %v1953_v35 }
 0x30e   : > { %2055 = vmatpush.bf16.msra.mxu0 %v1964_v56  ;;  %2846 = vmatpush.bf16.msra.mxu2 %v1964_v56 }
 0x30f   : > { %2081 = vmatpush.bf16.msra.mxu1 %v1971_v20  ;;  %2851 = vmatpush.bf16.msra.mxu3 %v1971_v20  ;;  %v2842_v20 = vld [vmem:[%s4148_s7] sm:$0x10] }
 0x312   : > { %2056 = vmatpush.bf16.msra.mxu0 %v4016_v36  ;;  %2847 = vmatpush.bf16.msra.mxu2 %v4016_v36  ;;  %v2838_v36 = vld [vmem:[%s4146_s5] sm:$0xff] }
 0x313   : > { %2082 = vmatpush.bf16.msra.mxu1 %v1969_v47  ;;  %2852 = vmatpush.bf16.msra.mxu3 %v1969_v47  ;;  %v2745_v47 = vor.u32 %v2842_v20, %v2744_v19 }
 0x316   : > { %2057 = vmatpush.bf16.msra.mxu0 %v4006_v62  ;;  %2848 = vmatpush.bf16.msra.mxu2 %v4006_v62 }
 0x317   : > { %2083 = vmatpush.bf16.msra.mxu1 %v1967_v29  ;;  %2853 = vmatpush.bf16.msra.mxu3 %v1967_v29 }
 0x31a   : > { %2058 = vmatpush.bf16.msra.mxu0 %v4001_v8  ;;  %2849 = vmatpush.bf16.msra.mxu2 %v4001_v8  ;;  %v2840_v8 = vld [vmem:[%s4146_s5 + $0x10] sm:$0xff] }
 0x31b   : > { %2084 = vmatpush.bf16.msra.mxu1 %v1965_v38  ;;  %2854 = vmatpush.bf16.msra.mxu3 %v1965_v38 }
 0x31e   : > { %2059 = vmatpush.bf16.msra.mxu0 %v3997_v21  ;;  %2850 = vmatpush.bf16.msra.mxu2 %v3997_v21  ;;  %v2839_v21 = vld [vmem:[%s4146_s5 + $0x8] sm:$0xff] }
 0x31f   : > { %2085 = vmatpush.bf16.msra.mxu1 %v4024_v54  ;;  %2855 = vmatpush.bf16.msra.mxu3 %v4024_v54  ;;  %v2021_v54 = vpop.permute.xlu0 %2020 }
 0x321   : > { %2060 = vmatmul.bf16.vlgmr.msra.gmra.mxu0 %v2838_v36  ;;  %2075 = vmatmul.bf16.vlgmr.msra.gmra.mxu2 %v2841_v15 }
 0x323   : > { %2086 = vmatpush.bf16.msra.mxu1 %v4013_v2  ;;  %2856 = vmatpush.bf16.msra.mxu3 %v4013_v2 }
 0x327   : > { %2087 = vmatpush.bf16.msra.mxu1 %v4004_v37  ;;  %2857 = vmatpush.bf16.msra.mxu3 %v4004_v37  ;;  %v2016_v9 = vpop.permute.xlu0 %2015 }
 0x32b   : > { %2088 = vmatpush.bf16.msra.mxu1 %v3999_v25  ;;  %2858 = vmatpush.bf16.msra.mxu3 %v3999_v25 }
 0x32e   : > { %2089 = vmatmul.bf16.vlgmr.msra.gmra.mxu1 %v2838_v36  ;;  %2104 = vmatmul.bf16.vlgmr.msra.gmra.mxu3 %v2841_v15 }
 0x32f   : > { %v1991_v0 = vpop.permute.xlu0 %1990 }
 0x331   : > { %2065 = vmatmul.bf16.gmra.mxu0 %v2839_v21 }
 0x33e   : > { %2094 = vmatmul.bf16.gmra.mxu1 %v2839_v21 }
 0x341   : > { %2070 = vmatmul.bf16.gmra.mxu0 %v2840_v8 }
 0x34e   : > { %2099 = vmatmul.bf16.gmra.mxu1 %v2840_v8 }
 0x39e   : > { %v2061_v62 = vpop.f32.mrf.mxu0 }
 0x39f   : > { %v2062_v35 = vadd.f32 %v2061_v62, %v1991_v0 }
 0x3a1   : > { %v2110_v18 = vmax.f32 %v2062_v35, 0.0 }
 0x3a4   : > { %v2076_v37 = vpop.f32.mrf.mxu2 }
 0x3a5   : > { %v2077_v63 = vadd.f32 %v2076_v37, %v2021_v54 }
 0x3a6   : > { %v2063_v2 = vpop.f32.mrf.mxu0 }
 0x3a7   : > { %v2122_v6 = vmax.f32 %v2077_v63, 0.0  ;;  %v2064_v59 = vadd.f32 %v2063_v2, %v1996_v23 }
 0x3a9   : > { %v2112_v56 = vmax.f32 %v2064_v59, 0.0 }
 0x3ab   : > { %v4084_v25 = vpop.f32.mrf.mxu1  ;;  %v2126_v43 = vpack.c.bf16 %v2112_v56, %v2110_v18 }
 0x3ac   : > { %v2078_v33 = vpop.f32.mrf.mxu2  ;;  %v2091_v15 = vadd.f32 %v4084_v25, %v1991_v0 }
 0x3ad   : > { %v2079_v1 = vadd.f32 %v2078_v33, %v2026_v34 }
 0x3ae   : > { %v2066_v48 = vpop.f32.mrf.mxu0  ;;  %v2111_v37 = vmax.f32 %v2091_v15, 0.0 }
 0x3af   : > { %v2124_v26 = vmax.f32 %v2079_v1, 0.0  ;;  %v2067_v45 = vadd.f32 %v2066_v48, %v2001_v16  ;;  %v2146_v1 = vpop.permute.xlu0 %2145 }
 0x3b1   : > { %v2132_v13 = vpack.c.bf16 %v2124_v26, %v2122_v6  ;;  %v2105_v30 = vpop.f32.mrf.mxu3  ;;  %v2114_v24 = vmax.f32 %v2067_v45, 0.0 }
 0x3b2   : > { %v2106_v49 = vadd.f32 %v2105_v30, %v2021_v54  ;;  %v2141_v54 = vpop.permute.xlu2 %2140 }
 0x3b3   : > { %v2092_v53 = vpop.f32.mrf.mxu1  ;;  %2161 = vmatpush.bf16.msrb.mxu2 %v2132_v13 }
 0x3b4   : > { %v2123_v11 = vmax.f32 %v2106_v49, 0.0  ;;  %v2093_v12 = vadd.f32 %v2092_v53, %v1996_v23 }
 0x3b6   : > { %v2068_v41 = vpop.f32.mrf.mxu0  ;;  %v2113_v8 = vmax.f32 %v2093_v12, 0.0 }
 0x3b7   : > { %v2069_v27 = vadd.f32 %v2068_v41, %v2006_v17 }
 0x3b8   : > { %v2127_v2 = vpack.c.bf16 %v2113_v8, %v2111_v37 }
 0x3b9   : > { %v2107_v46 = vpop.f32.mrf.mxu3  ;;  %v2116_v14 = vmax.f32 %v2069_v27, 0.0 }
 0x3ba   : > { %v2108_v10 = vadd.f32 %v2107_v46, %v2026_v34 }
 0x3bb   : > { %v2095_v42 = vpop.f32.mrf.mxu1  ;;  %v2128_v32 = vpack.c.bf16 %v2116_v14, %v2114_v24 }
 0x3bc   : > { %v2125_v50 = vmax.f32 %v2108_v10, 0.0  ;;  %v2096_v52 = vadd.f32 %v2095_v42, %v2001_v16 }
 0x3be   : > { %v2133_v39 = vpack.c.bf16 %v2125_v50, %v2123_v11  ;;  %v2071_v7 = vpop.f32.mrf.mxu0  ;;  %v2115_v21 = vmax.f32 %v2096_v52, 0.0 }
 0x3bf   : > { %v2072_v5 = vadd.f32 %v2071_v7, %v2011_v58 }
 0x3c0   : > { %2175 = vmatpush.bf16.msrb.mxu3 %v2133_v39  ;;  %v2185_v39 = vlaneseq }
 0x3c1   : > { %v2118_v40 = vmax.f32 %v2072_v5, 0.0 }
 0x3c3   : > { %v2097_v28 = vpop.f32.mrf.mxu1 }
 0x3c4   : > { %v2098_v51 = vadd.f32 %v2097_v28, %v2006_v17 }
 0x3c6   : > { %v2073_v61 = vpop.f32.mrf.mxu0  ;;  %v2117_v38 = vmax.f32 %v2098_v51, 0.0 }
 0x3c7   : > { %v2074_v4 = vadd.f32 %v2073_v61, %v2016_v9 }
 0x3c8   : > { %v2129_v62 = vpack.c.bf16 %v2117_v38, %v2115_v21 }
 0x3c9   : > { %v2120_v57 = vmax.f32 %v2074_v4, 0.0  ;;  %v2186_v4 = vshrl.u32 %v2185_v39, 7 }
 0x3cb   : > { %v2130_v22 = vpack.c.bf16 %v2120_v57, %v2118_v40  ;;  %v2100_v60 = vpop.f32.mrf.mxu1  ;;  %vm2188_vm5 = vcmp.lt.s32.totalorder %v2186_v4, 7 }
 0x3cc   : > { %v2101_v44 = vadd.f32 %v2100_v60, %v2011_v58 }
 0x3cd   : > { %2162 = vmatpush.bf16.msrb.mxu2 %v2130_v22 }
 0x3ce   : > { %v2119_v31 = vmax.f32 %v2101_v44, 0.0 }
 0x3d1   : > { %2163 = vmatpush.bf16.msrb.mxu2 %v2128_v32 }
 0x3d3   : > { %v2102_v3 = vpop.f32.mrf.mxu1 }
 0x3d4   : > { %v2103_v55 = vadd.f32 %v2102_v3, %v2016_v9 }
 0x3d5   : > { %2164 = vmatpush.bf16.msrb.mxu2 %v2126_v43 }
 0x3d6   : > { %v2121_v29 = vmax.f32 %v2103_v55, 0.0 }
 0x3d8   : > { %v2131_v36 = vpack.c.bf16 %v2121_v29, %v2119_v31  ;;  %2746 = vmatmul.msk.bf16.vlgmr.msrb.gmra.mxu2 %vm2153_vm0, %v2745_v47 }
 0x3da   : > { %2176 = vmatpush.bf16.msrb.mxu3 %v2131_v36 }
 0x3de   : > { %2177 = vmatpush.bf16.msrb.mxu3 %v2129_v62 }
 0x3e2   : > { %2178 = vmatpush.bf16.msrb.mxu3 %v2127_v2 }
 0x3e5   : > { %2747 = vmatmul.msk.bf16.vlgmr.msrb.gmra.mxu3 %vm2153_vm0, %v2745_v47 }
 0x45b   : > { %v2166_v63 = vpop.f32.mrf.mxu2 }
 0x45c   : > { %v2167_v34 = vadd.f32 %v2166_v63, %v2141_v54 }
 0x45e   : > { %v2748_v33 = vmul.f32 -1.442695, %v2167_v34 }
 0x460   : > { %2919 = vpow2.f32 %v2748_v33 }
 0x463   : > { %v2168_v48 = vpop.f32.mrf.mxu2 }
 0x464   : > { %v2169_v6 = vadd.f32 %v2168_v48, %v2146_v1 }
 0x466   : > { %v2920_v26 = vpop.eup %2919  ;;  %v2750_v25 = vmul.f32 -1.442695, %v2169_v6 }
 0x467   : > { %v2206_v13 = vadd.f32 1.0, %v2920_v26 }
 0x468   : > { %2921 = vpow2.f32 %v2750_v25  ;;  %v2180_v30 = vpop.f32.mrf.mxu3 }
 0x469   : > { %2923 = vrcp.f32 %v2206_v13  ;;  %v4095_v53 = vadd.f32 %v2180_v30, %v2141_v54  ;;  %v2221_v7 = vand.u32 2147483648, %v2206_v13  ;;  %v2219_v28 = vand.u32 2147483647, %v2206_v13 }
 0x46a   : > { %vm2215_vm2 = vweird.f32 %v2206_v13 }
 0x46b   : > { %v2749_v41 = vmul.f32 -1.442695, %v4095_v53  ;;  %v2222_v45 = vor.u32 1.1754944e-38, %v2221_v7  ;;  %vm2220_vm4 = vcmp.eq.f32.partialorder %v2219_v28, 8.507059e+37 }
 0x46d   : > { %2925 = vpow2.f32 %v2749_v41 }
 0x46e   : > { %v2922_v49 = vpop.eup %2921 }
 0x46f   : > { %v2924_v46 = vpop.eup %2923  ;;  %v2208_v10 = vadd.f32 1.0, %v2922_v49 }
 0x470   : > { %v2211_v42 = vmul.f32 %v2924_v46, %v2206_v13  ;;  %v2182_v58 = vpop.f32.mrf.mxu3  ;;  %vm2216_vm1 = vweird.f32 %v2924_v46 }
 0x471   : > { %2927 = vrcp.f32 %v2208_v10  ;;  %v2183_v50 = vadd.f32 %v2182_v58, %v2146_v1  ;;  %vm2217_vm3 = vmor %vm2215_vm2, %vm2216_vm1  ;;  %v2251_v60 = vand.u32 2147483648, %v2208_v10  ;;  %v2249_v56 = vand.u32 2147483647, %v2208_v10 }
 0x472   : > { %v2212_v11 = vsub.f32 1.0, %v2211_v42  ;;  %2929 = vtanh.f32 %v2167_v34  ;;  %vm2245_vm7 = vweird.f32 %v2208_v10 }
 0x473   : > { %v2926_v16 = vpop.eup %2925  ;;  %v2751_v5 = vmul.f32 -1.442695, %v2183_v50  ;;  %v2252_v43 = vor.u32 1.1754944e-38, %v2251_v60  ;;  %vm2250_vm9 = vcmp.eq.f32.partialorder %v2249_v56, 8.507059e+37 }
 0x474   : > { %v2213_v9 = vmul.f32 %v2924_v46, %v2212_v11  ;;  %v2207_v17 = vadd.f32 1.0, %v2926_v16 }
 0x475   : > { %2931 = vpow2.f32 %v2751_v5 }
 0x476   : > { %v2214_v61 = vadd.f32 %v2924_v46, %v2213_v9  ;;  %2933 = vrcp.f32 %v2207_v17  ;;  %v2236_v47 = vand.u32 2147483648, %v2207_v17  ;;  %v2234_v29 = vand.u32 2147483647, %v2207_v17 }
 0x477   : > { %v2928_v27 = vpop.eup %2927  ;;  %vm2230_vm11 = vweird.f32 %v2207_v17 }
 0x478   : > { %v2218_v40 = vsel %vm2217_vm3, %v2924_v46, %v2214_v61  ;;  %v2241_v57 = vmul.f32 %v2928_v27, %v2208_v10  ;;  %v2930_v22 = vpop.eup %2929  ;;  %vm2246_vm6 = vweird.f32 %v2928_v27  ;;  %v2237_v15 = vor.u32 1.1754944e-38, %v2236_v47 }
 0x479   : > { %v2223_v23 = vsel %vm2220_vm4, %v2222_v45, %v2218_v40  ;;  %vm2247_vm8 = vmor %vm2245_vm7, %vm2246_vm6  ;;  %vm2235_vm13 = vcmp.eq.f32.partialorder %v2234_v29, 8.507059e+37 }
 0x47a   : > { %v2270_v59 = vmul.f32 0.6, %v2223_v23  ;;  %v2242_v14 = vsub.f32 1.0, %v2241_v57 }
 0x47b   : > { %v2932_v0 = vpop.eup %2931 }
 0x47c   : > { %v2274_v35 = vadd.f32 0.8, %v2270_v59  ;;  %v2243_v24 = vmul.f32 %v2928_v27, %v2242_v14  ;;  %v2934_v32 = vpop.eup %2933  ;;  %v2209_v18 = vadd.f32 1.0, %v2932_v0 }
 0x47d   : > { %v2226_v44 = vmul.f32 %v2934_v32, %v2207_v17  ;;  %vm2231_vm10 = vweird.f32 %v2934_v32 }
 0x47e   : > { %v2278_v19 = vsel %vm2188_vm5, %v2930_v22, %v2274_v35  ;;  %v2244_v20 = vadd.f32 %v2928_v27, %v2243_v24  ;;  %2935 = vrcp.f32 %v2209_v18  ;;  %vm2232_vm12 = vmor %vm2230_vm11, %vm2231_vm10  ;;  %v2266_v54 = vand.u32 2147483648, %v2209_v18 }
 0x47f   : > { %2282 = vst [vmem:[%s4101_s30] sm:$0xff] %v2278_v19  ;;  %v2227_v51 = vsub.f32 1.0, %v2226_v44  ;;  %2937 = vtanh.f32 %v4095_v53  ;;  %v2264_v33 = vand.u32 2147483647, %v2209_v18  ;;  %vm2260_vm15 = vweird.f32 %v2209_v18 }
 0x480   : > { %v2248_v3 = vsel %vm2247_vm8, %v2928_v27, %v2244_v20  ;;  %v2267_v26 = vor.u32 1.1754944e-38, %v2266_v54 }
 0x481   : > { %v2253_v55 = vsel %vm2250_vm9, %v2252_v43, %v2248_v3  ;;  %v2228_v31 = vmul.f32 %v2934_v32, %v2227_v51  ;;  %vm2265_vm1 = vcmp.eq.f32.partialorder %v2264_v33, 8.507059e+37 }
 0x482   : > { %v2272_v52 = vmul.f32 0.6, %v2253_v55 }
 0x483   : > { %v2229_v38 = vadd.f32 %v2934_v32, %v2228_v31 }
 0x484   : > { %v2276_v12 = vadd.f32 0.8, %v2272_v52  ;;  %v2936_v36 = vpop.eup %2935 }
 0x485   : > { %v2233_v21 = vsel %vm2232_vm12, %v2934_v32, %v2229_v38  ;;  %v2256_v8 = vmul.f32 %v2936_v36, %v2209_v18  ;;  %vm2261_vm14 = vweird.f32 %v2936_v36  ;;  %v2938_v1 = vpop.eup %2937 }
 0x486   : > { %2284 = vst [vmem:[%s4101_s30 + $0x10] sm:$0x3] %v2276_v12  ;;  %v2238_v62 = vsel %vm2235_vm13, %v2237_v15, %v2233_v21  ;;  %vm2262_vm0 = vmor %vm2260_vm15, %vm2261_vm14  ;;  %v2310_v41 = vld [vmem:[%s4101_s30] sm:$0xff] (%p3094_p6) }
 0x487   : > { %v2271_v37 = vmul.f32 0.6, %v2238_v62  ;;  %v2257_v2 = vsub.f32 1.0, %v2256_v8  ;;  %2311 = vst [vmem:[%s2297_s16] sm:$0xff] (%p3094_p6), %v2310_v41 }
 0x489   : > { %v2275_v63 = vadd.f32 0.8, %v2271_v37  ;;  %v2258_v34 = vmul.f32 %v2936_v36, %v2257_v2 }
 0x48b   : > { %v2279_v48 = vsel %vm2188_vm5, %v2938_v1, %v2275_v63  ;;  %v2259_v6 = vadd.f32 %v2936_v36, %v2258_v34 }
 0x48c   : > { %2283 = vst [vmem:[%s4101_s30 + $0x8] sm:$0xff] %v2279_v48 }
 0x48d   : > { %v2263_v25 = vsel %vm2262_vm0, %v2936_v36, %v2259_v6  ;;  %v2314_v46 = vld [vmem:[%s4101_s30 + $0x10] sm:$0xff] (%p3094_p6) }
 0x48e   : > { %v2268_v13 = vsel %vm2265_vm1, %v2267_v26, %v2263_v25  ;;  %2315 = vst [vmem:[%s2297_s16 + $0x20] sm:$0xff] (%p3094_p6), %v2314_v46 }
 0x48f   : > { %v2273_v30 = vmul.f32 0.6, %v2268_v13  ;;  %2292 = sbr.rel (!%p3094_p6) target bundleno = 1180 (0x49c), region = 98 }
 0x491   : > { %v2277_v53 = vadd.f32 0.8, %v2273_v30 }
 0x493   : > { %2285 = vst [vmem:[%s4101_s30 + $0x18] sm:$0x3] %v2277_v53  ;;  %v2312_v49 = vld [vmem:[%s4101_s30 + $0x8] sm:$0xff] (%p3094_p6) }
 0x494   : > { %2313 = vst [vmem:[%s2297_s16 + $0x8] sm:$0xff] %v2312_v49 }
 0x49a   : > { %v2316_v10 = vld [vmem:[%s4101_s30 + $0x18] sm:$0xff] }
 0x49b   : > { %2317 = vst [vmem:[%s2297_s16 + $0x28] sm:$0xff] %v2316_v10 }
 0x49c PF: > { %s19_s15 = sadd.s32 1, %s2993_s15   ;;  %s4199_s20 = sld [smem:[#allocation4_spill]] }
 0x49d   : > { %p16_p12 = scmp.ge.s32.totalorder %s19_s15, 6   ;;  %s4200_s17 = sld [smem:[#allocation5_spill]] }
 0x49e   : > { %s4201_s30 = smov %s2973_s10  ;;  %s4202_s10 = smov %s3102_s24 }
 0x49f   : > { %s4203_s11 = smov %s2985_s13  ;;  %s4204_s12 = smov %s2989_s14 }
 0x4a0   :  { %18 = sbr.rel (!%p16_p12) target bundleno = 4 (0x4), region = 152 }
 0x4a2   : > { %s4205_s13 = smov %s4199_s20 }
 0x4a3   : > { %s4206_s14 = smov %s4200_s17 }

</bundles_post_ra>
